<compile_context>
chip_gen: v5e
topology: v5e:2x2
jax: 0.10.0
libtpu: 0.0.40
codegen_flags: <defaults>
</compile_context>

<pallas_src>
import functools
import math

import jax
import jax.numpy as jnp
from jax.experimental import pallas as pl
from jax.experimental.pallas import tpu as pltpu  # noqa: F401  (TPU backend)

NEG_SLOPE = 0.01   # nn.LeakyReLU default
BN_EPS = 1e-5      # nn.BatchNorm2d default


def fused_kernel(x_ref, w_ref, b_ref, g_ref, beta_ref, o_ref, *, H, W, scale):
    """conv1x1 + BatchNorm(batch stats) + LeakyReLU^2 + ReplicationPad(1,0,1,0) + AvgPool2d(2,1).

    Layout: rows (sublanes) = output channel c*scale^2 + i*scale + j,
            cols (lanes)    = flattened pixel n*H*W + h*W + w.
    """
    x = x_ref[...]                                  # (C_in, R)
    w = w_ref[...]                                  # (C_out, C_in)
    c_in = x.shape[0]
    r_tot = x.shape[1]

    # ---- 1x1 conv: unrolled broadcast-FMA on the VPU (K = C_in is far too small for the MXU).
    z = w[:, 0:1] * x[0:1, :]
    for k in range(1, c_in):
        z = z + w[:, k:k + 1] * x[k:k + 1, :]
    z = z + b_ref[...]                              # (C_out, R)

    # ---- BatchNorm2d (training-mode batch statistics): single reduction pass,
    #      folded into one per-channel scale/shift.
    inv_n = 1.0 / float(r_tot)
    mean = jnp.sum(z, axis=1, keepdims=True) * inv_n
    var = jnp.sum(z * z, axis=1, keepdims=True) * inv_n - mean * mean
    scl = g_ref[...] * jax.lax.rsqrt(var + BN_EPS)
    sft = beta_ref[...] - mean * scl
    zn = z * scl + sft

    # ---- LeakyReLU applied twice == one select with slope**2 on the negative branch.
    act = jnp.where(zn >= 0.0, zn, (NEG_SLOPE * NEG_SLOPE) * zn)

    # ---- ReplicationPad2d((1,0,1,0)) + AvgPool2d(2, stride=1) in pre-shuffle coords.
    #      With p = scale*h + i, q = scale*w + j:
    #        out[p, q] = 0.25 * (Y[p,q] + Y[p,qm] + Y[pm,q] + Y[pm,qm]),
    #      pm = max(p-1, 0), qm = max(q-1, 0).  The pixel shuffle is a pure permutation,
    #      so the blur is computed here and the permutation applied once afterwards.
    s2 = scale * scale
    ch = jax.lax.broadcasted_iota(jnp.int32, act.shape, 0)   # c*s2 + i*scale + j
    px = jax.lax.broadcasted_iota(jnp.int32, act.shape, 1)   # n*H*W + h*W + w

    j_ge1 = (ch % scale) != 0          # q-1 stays inside the same source column w
    w_ge1 = (px % W) != 0              # q-1 falls into source column w-1
    i_ge1 = (ch % s2) >= scale         # p-1 stays inside the same source row h
    h_ge1 = (px % (H * W)) >= W        # p-1 falls into source row h-1

    # left neighbour Y[p, max(q-1,0)]  (wrapped positions are masked out by the selects)
    left_same = jnp.roll(act, 1, axis=0)                                    # (c, i, j-1)
    left_prev = jnp.roll(jnp.roll(act, 1, axis=1), -(scale - 1), axis=0)    # (c, i, s-1) @ w-1
    hsum = act + jnp.where(j_ge1, left_same, jnp.where(w_ge1, left_prev, act))

    # top neighbour Y[max(p-1,0), q] of the horizontal pair-sum
    up_same = jnp.roll(hsum, scale, axis=0)                                 # (c, i-1, j)
    up_prev = jnp.roll(jnp.roll(hsum, W, axis=1), -(s2 - scale), axis=0)    # (c, s-1, j) @ h-1
    vsum = hsum + jnp.where(i_ge1, up_same, jnp.where(h_ge1, up_prev, hsum))

    o_ref[...] = 0.25 * vsum


@functools.partial(jax.jit, static_argnames=("nf", "scale"))
def pixel_shuffle_icnr_forward(x, weight, bias, gamma, beta, *, nf, scale):
    N, C_in, H, W = x.shape
    C_out = nf * scale * scale
    R = N * H * W
    assert weight.shape == (C_out, C_in)

    # NCHW -> (C_in, N*H*W): channels on sublanes, pixels lane-dense (R % 128 == 0 here).
    x_t = jnp.transpose(x, (1, 0, 2, 3)).reshape(C_in, R).astype(jnp.float32)
    w = weight.astype(jnp.float32)
    b = bias.reshape(C_out, 1).astype(jnp.float32)
    g = gamma.reshape(C_out, 1).astype(jnp.float32)
    bt = beta.reshape(C_out, 1).astype(jnp.float32)

    kernel = functools.partial(fused_kernel, H=H, W=W, scale=scale)

    blurred = pl.pallas_call(
        kernel,
        out_shape=jax.ShapeDtypeStruct((C_out, R), jnp.float32),
        grid=(1,),
        in_specs=[
            pl.BlockSpec((C_in, R), lambda i: (0, 0)),
            pl.BlockSpec((C_out, C_in), lambda i: (0, 0)),
            pl.BlockSpec((C_out, 1), lambda i: (0, 0)),
            pl.BlockSpec((C_out, 1), lambda i: (0, 0)),
            pl.BlockSpec((C_out, 1), lambda i: (0, 0)),
        ],
        out_specs=pl.BlockSpec((C_out, R), lambda i: (0, 0)),
    )(x_t, w, b, g, bt)

    # Final PixelShuffle permutation of the already-blurred result (pure data movement).
    out = blurred.reshape(nf, scale, scale, N, H, W)
    out = jnp.transpose(out, (3, 0, 4, 1, 5, 2))        # (n, c, h, i, w, j)
    return out.reshape(N, nf, H * scale, W * scale)


def reference_forward(x, weight, bias, gamma, beta, nf, scale):
    """Pure-JAX reference (independent NCHW formulation) for the correctness check."""
    N, C_in, H, W = x.shape
    z = jnp.einsum("nchw,dc->ndhw", x, weight) + bias.reshape(1, -1, 1, 1)
    mean = jnp.mean(z, axis=(0, 2, 3), keepdims=True)
    var = jnp.mean((z - mean) ** 2, axis=(0, 2, 3), keepdims=True)
    zn = (z - mean) / jnp.sqrt(var + BN_EPS) * gamma.reshape(1, -1, 1, 1) \
        + beta.reshape(1, -1, 1, 1)
    a = jnp.where(zn >= 0, zn, NEG_SLOPE * zn)
    a = jnp.where(a >= 0, a, NEG_SLOPE * a)
    a = a.reshape(N, nf, scale, scale, H, W)
    a = jnp.transpose(a, (0, 1, 4, 2, 5, 3)).reshape(N, nf, H * scale, W * scale)
    p = jnp.pad(a, ((0, 0), (0, 0), (1, 0), (1, 0)), mode="edge")
    return 0.25 * (p[:, :, :-1, :-1] + p[:, :, :-1, 1:] + p[:, :, 1:, :-1] + p[:, :, 1:, 1:])


if __name__ == "__main__":
    ni, nf, scale = 4, 4, 4
    N, H, W = 2, 16, 16
    C_out = nf * scale ** 2

    key = jax.random.PRNGKey(0)
    k_x, k_w, k_b = jax.random.split(key, 3)

    x = jax.random.normal(k_x, (N, ni, H, W), jnp.float32)

    # ICNR init: kaiming-normal base 1x1 kernel of shape (C_out // scale^2, ni), each base
    # filter repeated scale^2 times along the output-channel axis.
    fan_in = ni  # 1x1 kernel
    std = math.sqrt(2.0 / fan_in)
    base = jax.random.normal(k_w, (C_out // scale ** 2, ni), jnp.float32) * std
    weight = jnp.repeat(base, scale ** 2, axis=0)          # (C_out, ni)

    bound = 1.0 / math.sqrt(fan_in)                        # PyTorch Conv2d bias init range
    bias = jax.random.uniform(k_b, (C_out,), jnp.float32, -bound, bound)
    gamma = jnp.ones((C_out,), jnp.float32)                # BatchNorm2d default affine init
    beta = jnp.zeros((C_out,), jnp.float32)

    out = pixel_shuffle_icnr_forward(x, weight, bias, gamma, beta, nf=nf, scale=scale)
    out = jax.block_until_ready(out)

    assert out.shape == (N, nf, H * scale, W * scale), out.shape
    ref = reference_forward(x, weight, bias, gamma, beta, nf, scale)
    max_err = float(jnp.max(jnp.abs(out - ref)))
    assert math.isfinite(max_err) and max_err < 1e-3, f"max_err={max_err}"

    print("KERNEL_OK")
</pallas_src>

<mosaic_0001>
module attributes {stable_mosaic.version = 11 : i64} {
  func.func @fused_kernel(%arg0: i32, %arg1: memref<4x512xf32, #tpu.memory_space<vmem>>, %arg2: memref<64x4xf32, #tpu.memory_space<vmem>>, %arg3: memref<64x1xf32, #tpu.memory_space<vmem>>, %arg4: memref<64x1xf32, #tpu.memory_space<vmem>>, %arg5: memref<64x1xf32, #tpu.memory_space<vmem>>, %arg6: memref<64x512xf32, #tpu.memory_space<vmem>>) attributes {dimension_semantics = [#tpu.dimension_semantics<arbitrary>], iteration_bounds = array<i64: 1>, scalar_prefetch = 0 : i64, scratch_operands = 0 : i64, tpu.core_type = #tpu.core_type<tc>, window_params = [{pipeline_mode = #tpu.pipeline_mode<synchronous>, transform_indices = @transform_0, window_bounds = array<i64: 4, 512>}, {pipeline_mode = #tpu.pipeline_mode<synchronous>, transform_indices = @transform_1, window_bounds = array<i64: 64, 4>}, {pipeline_mode = #tpu.pipeline_mode<synchronous>, transform_indices = @transform_2, window_bounds = array<i64: 64, 1>}, {pipeline_mode = #tpu.pipeline_mode<synchronous>, transform_indices = @transform_3, window_bounds = array<i64: 64, 1>}, {pipeline_mode = #tpu.pipeline_mode<synchronous>, transform_indices = @transform_4, window_bounds = array<i64: 64, 1>}, {pipeline_mode = #tpu.pipeline_mode<synchronous>, transform_indices = @transform_5, window_bounds = array<i64: 64, 512>}]} {
    %c0 = arith.constant 0 : index
    %c0_0 = arith.constant 0 : index
    %0 = vector.load %arg1[%c0, %c0_0] : memref<4x512xf32, #tpu.memory_space<vmem>>, vector<4x512xf32>
    %c0_1 = arith.constant 0 : index
    %c0_2 = arith.constant 0 : index
    %1 = vector.load %arg2[%c0_1, %c0_2] : memref<64x4xf32, #tpu.memory_space<vmem>>, vector<64x4xf32>
    %2 = vector.extract_strided_slice %1 {offsets = [0, 0], sizes = [64, 1], strides = [1, 1]} : vector<64x4xf32> to vector<64x1xf32>
    %3 = vector.extract_strided_slice %0 {offsets = [0, 0], sizes = [1, 512], strides = [1, 1]} : vector<4x512xf32> to vector<1x512xf32>
    %4 = vector.broadcast %2 : vector<64x1xf32> to vector<64x512xf32>
    %5 = vector.broadcast %3 : vector<1x512xf32> to vector<64x512xf32>
    %6 = arith.mulf %4, %5 : vector<64x512xf32>
    %7 = vector.extract_strided_slice %1 {offsets = [0, 1], sizes = [64, 1], strides = [1, 1]} : vector<64x4xf32> to vector<64x1xf32>
    %8 = vector.extract_strided_slice %0 {offsets = [1, 0], sizes = [1, 512], strides = [1, 1]} : vector<4x512xf32> to vector<1x512xf32>
    %9 = vector.broadcast %7 : vector<64x1xf32> to vector<64x512xf32>
    %10 = vector.broadcast %8 : vector<1x512xf32> to vector<64x512xf32>
    %11 = arith.mulf %9, %10 : vector<64x512xf32>
    %12 = arith.addf %6, %11 : vector<64x512xf32>
    %13 = vector.extract_strided_slice %1 {offsets = [0, 2], sizes = [64, 1], strides = [1, 1]} : vector<64x4xf32> to vector<64x1xf32>
    %14 = vector.extract_strided_slice %0 {offsets = [2, 0], sizes = [1, 512], strides = [1, 1]} : vector<4x512xf32> to vector<1x512xf32>
    %15 = vector.broadcast %13 : vector<64x1xf32> to vector<64x512xf32>
    %16 = vector.broadcast %14 : vector<1x512xf32> to vector<64x512xf32>
    %17 = arith.mulf %15, %16 : vector<64x512xf32>
    %18 = arith.addf %12, %17 : vector<64x512xf32>
    %19 = vector.extract_strided_slice %1 {offsets = [0, 3], sizes = [64, 1], strides = [1, 1]} : vector<64x4xf32> to vector<64x1xf32>
    %20 = vector.extract_strided_slice %0 {offsets = [3, 0], sizes = [1, 512], strides = [1, 1]} : vector<4x512xf32> to vector<1x512xf32>
    %21 = vector.broadcast %19 : vector<64x1xf32> to vector<64x512xf32>
    %22 = vector.broadcast %20 : vector<1x512xf32> to vector<64x512xf32>
    %23 = arith.mulf %21, %22 : vector<64x512xf32>
    %24 = arith.addf %18, %23 : vector<64x512xf32>
    %c0_3 = arith.constant 0 : index
    %c0_4 = arith.constant 0 : index
    %25 = vector.load %arg3[%c0_3, %c0_4] : memref<64x1xf32, #tpu.memory_space<vmem>>, vector<64x1xf32>
    %26 = vector.broadcast %25 : vector<64x1xf32> to vector<64x512xf32>
    %27 = arith.addf %24, %26 : vector<64x512xf32>
    %cst = arith.constant dense<0.000000e+00> : vector<64xf32>
    %28 = vector.multi_reduction <add>, %27, %cst [1] : vector<64x512xf32> to vector<64xf32>
    %29 = vector.shape_cast %28 : vector<64xf32> to vector<64x1xf32>
    %cst_5 = arith.constant 0.001953125 : f32
    %30 = vector.broadcast %cst_5 : f32 to vector<64x1xf32>
    %31 = arith.mulf %29, %30 : vector<64x1xf32>
    %32 = arith.mulf %27, %27 : vector<64x512xf32>
    %cst_6 = arith.constant dense<0.000000e+00> : vector<64xf32>
    %33 = vector.multi_reduction <add>, %32, %cst_6 [1] : vector<64x512xf32> to vector<64xf32>
    %34 = vector.shape_cast %33 : vector<64xf32> to vector<64x1xf32>
    %cst_7 = arith.constant 0.001953125 : f32
    %35 = vector.broadcast %cst_7 : f32 to vector<64x1xf32>
    %36 = arith.mulf %34, %35 : vector<64x1xf32>
    %37 = arith.mulf %31, %31 : vector<64x1xf32>
    %38 = arith.subf %36, %37 : vector<64x1xf32>
    %c0_8 = arith.constant 0 : index
    %c0_9 = arith.constant 0 : index
    %39 = vector.load %arg4[%c0_8, %c0_9] : memref<64x1xf32, #tpu.memory_space<vmem>>, vector<64x1xf32>
    %cst_10 = arith.constant 9.99999974E-6 : f32
    %40 = vector.broadcast %cst_10 : f32 to vector<64x1xf32>
    %41 = arith.addf %38, %40 : vector<64x1xf32>
    %42 = math.rsqrt %41 : vector<64x1xf32>
    %43 = arith.mulf %39, %42 : vector<64x1xf32>
    %c0_11 = arith.constant 0 : index
    %c0_12 = arith.constant 0 : index
    %44 = vector.load %arg5[%c0_11, %c0_12] : memref<64x1xf32, #tpu.memory_space<vmem>>, vector<64x1xf32>
    %45 = arith.mulf %31, %43 : vector<64x1xf32>
    %46 = arith.subf %44, %45 : vector<64x1xf32>
    %47 = vector.broadcast %43 : vector<64x1xf32> to vector<64x512xf32>
    %48 = arith.mulf %27, %47 : vector<64x512xf32>
    %49 = vector.broadcast %46 : vector<64x1xf32> to vector<64x512xf32>
    %50 = arith.addf %48, %49 : vector<64x512xf32>
    %cst_13 = arith.constant 0.000000e+00 : f32
    %51 = vector.broadcast %cst_13 : f32 to vector<64x512xf32>
    %52 = arith.cmpf oge, %50, %51 : vector<64x512xf32>
    %cst_14 = arith.constant 9.99999974E-5 : f32
    %53 = vector.broadcast %cst_14 : f32 to vector<64x512xf32>
    %54 = arith.mulf %53, %50 : vector<64x512xf32>
    %55 = arith.select %52, %50, %54 : vector<64x512xi1>, vector<64x512xf32>
    %56 = tpu.iota {dimensions = array<i32: 0>} : vector<64x512xi32>
    %57 = tpu.iota {dimensions = array<i32: 1>} : vector<64x512xi32>
    %c4_i32 = arith.constant 4 : i32
    %c0_i32 = arith.constant 0 : i32
    %58 = arith.cmpi eq, %c4_i32, %c0_i32 : i32
    %c1_i32 = arith.constant 1 : i32
    %59 = arith.select %58, %c1_i32, %c4_i32 : i32
    %60 = vector.broadcast %59 : i32 to vector<64x512xi32>
    %61 = arith.remsi %56, %60 : vector<64x512xi32>
    %c0_i32_15 = arith.constant 0 : i32
    %62 = vector.broadcast %c0_i32_15 : i32 to vector<64x512xi32>
    %63 = arith.cmpi ne, %61, %62 : vector<64x512xi32>
    %c0_i32_16 = arith.constant 0 : i32
    %64 = vector.broadcast %c0_i32_16 : i32 to vector<64x512xi32>
    %65 = arith.cmpi slt, %61, %64 : vector<64x512xi32>
    %c0_i32_17 = arith.constant 0 : i32
    %66 = arith.cmpi slt, %59, %c0_i32_17 : i32
    %67 = vector.broadcast %66 : i1 to vector<64x512xi1>
    %68 = vector.broadcast %67 : vector<64x512xi1> to vector<64x512xi1>
    %69 = arith.xori %65, %68 : vector<64x512xi1>
    %70 = arith.andi %69, %63 : vector<64x512xi1>
    %71 = vector.broadcast %59 : i32 to vector<64x512xi32>
    %72 = arith.addi %61, %71 : vector<64x512xi32>
    %73 = arith.select %70, %72, %61 : vector<64x512xi1>, vector<64x512xi32>
    %c0_i32_18 = arith.constant 0 : i32
    %74 = vector.broadcast %c0_i32_18 : i32 to vector<64x512xi32>
    %75 = arith.cmpi ne, %73, %74 : vector<64x512xi32>
    %c16_i32 = arith.constant 16 : i32
    %c0_i32_19 = arith.constant 0 : i32
    %76 = arith.cmpi eq, %c16_i32, %c0_i32_19 : i32
    %c1_i32_20 = arith.constant 1 : i32
    %77 = arith.select %76, %c1_i32_20, %c16_i32 : i32
    %78 = vector.broadcast %77 : i32 to vector<64x512xi32>
    %79 = arith.remsi %57, %78 : vector<64x512xi32>
    %c0_i32_21 = arith.constant 0 : i32
    %80 = vector.broadcast %c0_i32_21 : i32 to vector<64x512xi32>
    %81 = arith.cmpi ne, %79, %80 : vector<64x512xi32>
    %c0_i32_22 = arith.constant 0 : i32
    %82 = vector.broadcast %c0_i32_22 : i32 to vector<64x512xi32>
    %83 = arith.cmpi slt, %79, %82 : vector<64x512xi32>
    %c0_i32_23 = arith.constant 0 : i32
    %84 = arith.cmpi slt, %77, %c0_i32_23 : i32
    %85 = vector.broadcast %84 : i1 to vector<64x512xi1>
    %86 = vector.broadcast %85 : vector<64x512xi1> to vector<64x512xi1>
    %87 = arith.xori %83, %86 : vector<64x512xi1>
    %88 = arith.andi %87, %81 : vector<64x512xi1>
    %89 = vector.broadcast %77 : i32 to vector<64x512xi32>
    %90 = arith.addi %79, %89 : vector<64x512xi32>
    %91 = arith.select %88, %90, %79 : vector<64x512xi1>, vector<64x512xi32>
    %c0_i32_24 = arith.constant 0 : i32
    %92 = vector.broadcast %c0_i32_24 : i32 to vector<64x512xi32>
    %93 = arith.cmpi ne, %91, %92 : vector<64x512xi32>
    %c16_i32_25 = arith.constant 16 : i32
    %c0_i32_26 = arith.constant 0 : i32
    %94 = arith.cmpi eq, %c16_i32_25, %c0_i32_26 : i32
    %c1_i32_27 = arith.constant 1 : i32
    %95 = arith.select %94, %c1_i32_27, %c16_i32_25 : i32
    %96 = vector.broadcast %95 : i32 to vector<64x512xi32>
    %97 = arith.remsi %56, %96 : vector<64x512xi32>
    %c0_i32_28 = arith.constant 0 : i32
    %98 = vector.broadcast %c0_i32_28 : i32 to vector<64x512xi32>
    %99 = arith.cmpi ne, %97, %98 : vector<64x512xi32>
    %c0_i32_29 = arith.constant 0 : i32
    %100 = vector.broadcast %c0_i32_29 : i32 to vector<64x512xi32>
    %101 = arith.cmpi slt, %97, %100 : vector<64x512xi32>
    %c0_i32_30 = arith.constant 0 : i32
    %102 = arith.cmpi slt, %95, %c0_i32_30 : i32
    %103 = vector.broadcast %102 : i1 to vector<64x512xi1>
    %104 = vector.broadcast %103 : vector<64x512xi1> to vector<64x512xi1>
    %105 = arith.xori %101, %104 : vector<64x512xi1>
    %106 = arith.andi %105, %99 : vector<64x512xi1>
    %107 = vector.broadcast %95 : i32 to vector<64x512xi32>
    %108 = arith.addi %97, %107 : vector<64x512xi32>
    %109 = arith.select %106, %108, %97 : vector<64x512xi1>, vector<64x512xi32>
    %c4_i32_31 = arith.constant 4 : i32
    %110 = vector.broadcast %c4_i32_31 : i32 to vector<64x512xi32>
    %111 = arith.cmpi sge, %109, %110 : vector<64x512xi32>
    %c256_i32 = arith.constant 256 : i32
    %c0_i32_32 = arith.constant 0 : i32
    %112 = arith.cmpi eq, %c256_i32, %c0_i32_32 : i32
    %c1_i32_33 = arith.constant 1 : i32
    %113 = arith.select %112, %c1_i32_33, %c256_i32 : i32
    %114 = vector.broadcast %113 : i32 to vector<64x512xi32>
    %115 = arith.remsi %57, %114 : vector<64x512xi32>
    %c0_i32_34 = arith.constant 0 : i32
    %116 = vector.broadcast %c0_i32_34 : i32 to vector<64x512xi32>
    %117 = arith.cmpi ne, %115, %116 : vector<64x512xi32>
    %c0_i32_35 = arith.constant 0 : i32
    %118 = vector.broadcast %c0_i32_35 : i32 to vector<64x512xi32>
    %119 = arith.cmpi slt, %115, %118 : vector<64x512xi32>
    %c0_i32_36 = arith.constant 0 : i32
    %120 = arith.cmpi slt, %113, %c0_i32_36 : i32
    %121 = vector.broadcast %120 : i1 to vector<64x512xi1>
    %122 = vector.broadcast %121 : vector<64x512xi1> to vector<64x512xi1>
    %123 = arith.xori %119, %122 : vector<64x512xi1>
    %124 = arith.andi %123, %117 : vector<64x512xi1>
    %125 = vector.broadcast %113 : i32 to vector<64x512xi32>
    %126 = arith.addi %115, %125 : vector<64x512xi32>
    %127 = arith.select %124, %126, %115 : vector<64x512xi1>, vector<64x512xi32>
    %c16_i32_37 = arith.constant 16 : i32
    %128 = vector.broadcast %c16_i32_37 : i32 to vector<64x512xi32>
    %129 = arith.cmpi sge, %127, %128 : vector<64x512xi32>
    %130 = vector.extract_strided_slice %55 {offsets = [63, 0], sizes = [1, 512], strides = [1, 1]} : vector<64x512xf32> to vector<1x512xf32>
    %131 = vector.extract_strided_slice %55 {offsets = [0, 0], sizes = [63, 512], strides = [1, 1]} : vector<64x512xf32> to vector<63x512xf32>
    %132 = tpu.concatenate %130, %131 in 0 : vector<1x512xf32>, vector<63x512xf32> -> vector<64x512xf32>
    %133 = vector.extract_strided_slice %55 {offsets = [0, 511], sizes = [64, 1], strides = [1, 1]} : vector<64x512xf32> to vector<64x1xf32>
    %134 = vector.extract_strided_slice %55 {offsets = [0, 0], sizes = [64, 511], strides = [1, 1]} : vector<64x512xf32> to vector<64x511xf32>
    %135 = tpu.concatenate %133, %134 in 1 : vector<64x1xf32>, vector<64x511xf32> -> vector<64x512xf32>
    %136 = vector.extract_strided_slice %135 {offsets = [3, 0], sizes = [61, 512], strides = [1, 1]} : vector<64x512xf32> to vector<61x512xf32>
    %137 = vector.extract_strided_slice %135 {offsets = [0, 0], sizes = [3, 512], strides = [1, 1]} : vector<64x512xf32> to vector<3x512xf32>
    %138 = tpu.concatenate %136, %137 in 0 : vector<61x512xf32>, vector<3x512xf32> -> vector<64x512xf32>
    %139 = arith.select %93, %138, %55 : vector<64x512xi1>, vector<64x512xf32>
    %140 = arith.select %75, %132, %139 : vector<64x512xi1>, vector<64x512xf32>
    %141 = arith.addf %55, %140 : vector<64x512xf32>
    %142 = vector.extract_strided_slice %141 {offsets = [60, 0], sizes = [4, 512], strides = [1, 1]} : vector<64x512xf32> to vector<4x512xf32>
    %143 = vector.extract_strided_slice %141 {offsets = [0, 0], sizes = [60, 512], strides = [1, 1]} : vector<64x512xf32> to vector<60x512xf32>
    %144 = tpu.concatenate %142, %143 in 0 : vector<4x512xf32>, vector<60x512xf32> -> vector<64x512xf32>
    %145 = vector.extract_strided_slice %141 {offsets = [0, 496], sizes = [64, 16], strides = [1, 1]} : vector<64x512xf32> to vector<64x16xf32>
    %146 = vector.extract_strided_slice %141 {offsets = [0, 0], sizes = [64, 496], strides = [1, 1]} : vector<64x512xf32> to vector<64x496xf32>
    %147 = tpu.concatenate %145, %146 in 1 : vector<64x16xf32>, vector<64x496xf32> -> vector<64x512xf32>
    %148 = vector.extract_strided_slice %147 {offsets = [12, 0], sizes = [52, 512], strides = [1, 1]} : vector<64x512xf32> to vector<52x512xf32>
    %149 = vector.extract_strided_slice %147 {offsets = [0, 0], sizes = [12, 512], strides = [1, 1]} : vector<64x512xf32> to vector<12x512xf32>
    %150 = tpu.concatenate %148, %149 in 0 : vector<52x512xf32>, vector<12x512xf32> -> vector<64x512xf32>
    %151 = arith.select %129, %150, %141 : vector<64x512xi1>, vector<64x512xf32>
    %152 = arith.select %111, %144, %151 : vector<64x512xi1>, vector<64x512xf32>
    %153 = arith.addf %141, %152 : vector<64x512xf32>
    %cst_38 = arith.constant 2.500000e-01 : f32
    %154 = vector.broadcast %cst_38 : f32 to vector<64x512xf32>
    %155 = arith.mulf %154, %153 : vector<64x512xf32>
    %c0_39 = arith.constant 0 : index
    %c0_40 = arith.constant 0 : index
    %156 = vector.load %arg6[%c0_39, %c0_40] : memref<64x512xf32, #tpu.memory_space<vmem>>, vector<64x512xf32>
    tpu.vector_store %arg6[%c0_39, %c0_40], %155 {strides = array<i32>} : memref<64x512xf32, #tpu.memory_space<vmem>>, vector<64x512xf32>,
    return
  }
  func.func @transform_0(%arg0: i32) -> (i32, i32) {
    %c0_i32 = arith.constant 0 : i32
    %c0_i32_0 = arith.constant 0 : i32
    %c0_i32_1 = arith.constant 0 : i32
    return %c0_i32, %c0_i32_0 : i32, i32
  }
  func.func @transform_1(%arg0: i32) -> (i32, i32) {
    %c0_i32 = arith.constant 0 : i32
    %c0_i32_0 = arith.constant 0 : i32
    %c0_i32_1 = arith.constant 0 : i32
    return %c0_i32, %c0_i32_0 : i32, i32
  }
  func.func @transform_2(%arg0: i32) -> (i32, i32) {
    %c0_i32 = arith.constant 0 : i32
    %c0_i32_0 = arith.constant 0 : i32
    %c0_i32_1 = arith.constant 0 : i32
    return %c0_i32, %c0_i32_0 : i32, i32
  }
  func.func @transform_3(%arg0: i32) -> (i32, i32) {
    %c0_i32 = arith.constant 0 : i32
    %c0_i32_0 = arith.constant 0 : i32
    %c0_i32_1 = arith.constant 0 : i32
    return %c0_i32, %c0_i32_0 : i32, i32
  }
  func.func @transform_4(%arg0: i32) -> (i32, i32) {
    %c0_i32 = arith.constant 0 : i32
    %c0_i32_0 = arith.constant 0 : i32
    %c0_i32_1 = arith.constant 0 : i32
    return %c0_i32, %c0_i32_0 : i32, i32
  }
  func.func @transform_5(%arg0: i32) -> (i32, i32) {
    %c0_i32 = arith.constant 0 : i32
    %c0_i32_0 = arith.constant 0 : i32
    %c0_i32_1 = arith.constant 0 : i32
    return %c0_i32, %c0_i32_0 : i32, i32
  }
}

</mosaic_0001>

<bundles_post_ra>
// kernel: pixel_shuffle_icnr_forward.1
= control target key start
LH: loop header
LB: loop body
LE: loop exit
PB: predicated region body
PF: predicated region fallthrough
CT: control target
= control target key end

     0   :  { %v2363_v0 = vmov 1   ;;  %v2364_v1 = vmov 0   ;;  %v2365_v10 = vmov 2   ;;  %v2366_v11 = vmov 3   ;;  %s2368_s8 = smov 16   ;;  %s4745_s1 = inlined_call_operand.vmem [shape: f32[64,4], index: 1, kind: input, shape index: {}]   ;;  %s4746_s2 = inlined_call_operand.vmem [shape: f32[64,1], index: 2, kind: input, shape index: {}]   ;;  %s4747_s0 = inlined_call_operand.vmem [shape: f32[4,512], index: 0, kind: input, shape index: {}]   ;;  %s4748_s3 = inlined_call_operand.vmem [shape: f32[64,1], index: 3, kind: input, shape index: {}]   ;;  %s4749_s4 = inlined_call_operand.vmem [shape: f32[64,1], index: 4, kind: input, shape index: {}]   ;;  %s4750_s5 = inlined_call_operand.vmem [shape: f32[64,512], index: 5, kind: output, shape index: {}]  }
   0x1   :  { %2336 = vset.pattern.permute.xlu0 %v2363_v0  ;;  %2334 = vset.pattern.permute.xlu2 %v2364_v1  ;;  %v26_v2 = vld [vmem:[%s4745_s1 + $0x20] sm:$0xff]  ;;  %v24_v3 = vld [vmem:[%s4745_s1 + $0x10] sm:$0xff]  ;;  %v23_v4 = vld [vmem:[%s4745_s1 + $0x8] sm:$0xff] }
   0x2   :  { %2333 = vset.pattern.permute.xlu1 %v2364_v1  ;;  %52 = vperm.xlu2 %2334, %v26_v2   ;;  %v27_v5 = vld [vmem:[%s4745_s1 + $0x28] sm:$0xff]  ;;  %v25_v6 = vld [vmem:[%s4745_s1 + $0x18] sm:$0xff]  ;;  %v28_v7 = vld [vmem:[%s4745_s1 + $0x30] sm:$0xff] }
   0x3   :  { %42 = vperm.xlu1 %2333, %v24_v3   ;;  %121 = vperm.xlu0 %2336, %v23_v4   ;;  %v29_v8 = vld [vmem:[%s4745_s1 + $0x38] sm:$0xff]  ;;  %v22_v9 = vld [vmem:[%s4745_s1] sm:$0xff]  ;;  %v441_v12 = vld [vmem:[%s4746_s2 + $0x8] sm:$0xff] }
   0x4   :  { %v446_v13 = vld [vmem:[%s4746_s2 + $0x30] sm:$0xff]  ;;  %v440_v15 = vld [vmem:[%s4746_s2] sm:$0xff]  ;;  %v443_v18 = vld [vmem:[%s4746_s2 + $0x18] sm:$0xff] }
   0x5   :  { %v442_v17 = vld [vmem:[%s4746_s2 + $0x10] sm:$0xff]  ;;  %v444_v19 = vld [vmem:[%s4746_s2 + $0x20] sm:$0xff]  ;;  %v445_v20 = vld [vmem:[%s4746_s2 + $0x28] sm:$0xff] }
   0x6   :  { %v2456_v22 = vld [vmem:[%s4747_s0 + $0x8] sm:$0xff]  ;;  %v2461_v23 = vld [vmem:[%s4747_s0] sm:$0xff]  ;;  %v447_v25 = vld [vmem:[%s4746_s2 + $0x38] sm:$0xff] }
   0x7   :  { %v151_v24 = vperm.slane %v2456_v22, 5  ;;  %v72_v28 = vperm.slane %v2461_v23, 0  ;;  %v73_v30 = vperm.slane %v2461_v23, 4  ;;  %v74_v31 = vperm.slane %v2456_v22, 0 }
   0x8   :  { %v75_v32 = vperm.slane %v2456_v22, 4  ;;  %v148_v34 = vperm.slane %v2461_v23, 1  ;;  %v149_v35 = vperm.slane %v2461_v23, 5  ;;  %v150_v36 = vperm.slane %v2456_v22, 1 }
   0x9   :  { %v2475_v33 = vperm.slane %v151_v24, 1  ;;  %v2480_v37 = vperm.slane %v72_v28, 0  ;;  %v2482_v38 = vperm.slane %v73_v30, 0  ;;  %v2484_v39 = vperm.slane %v74_v31, 0 }
   0xa   :  { %57 = vperm.xlu2 %2334, %v27_v5   ;;  %v2486_v40 = vperm.slane %v75_v32, 0  ;;  %v2490_v42 = vperm.slane %v148_v34, 1  ;;  %v2492_v43 = vperm.slane %v149_v35, 1  ;;  %v2494_v44 = vperm.slane %v150_v36, 1 }
   0xb   :  { %47 = vperm.xlu1 %2333, %v25_v6   ;;  %141 = vperm.xlu0 %2336, %v28_v7  }
  0x12   :  { %2335 = vset.pattern.permute.xlu2 %v2363_v0 }
  0x13   :  { %67 = vperm.xlu1 %2333, %v29_v8   ;;  %2339 = vset.pattern.permute.xlu0 %v2365_v10 }
  0x14   :  { %229 = vperm.xlu0 %2339, %v23_v4   ;;  %117 = vperm.xlu2 %2335, %v22_v9  }
  0x1b   :  { %2337 = vset.pattern.permute.xlu1 %v2363_v0 }
  0x1c   :  { %125 = vperm.xlu1 %2337, %v24_v3   ;;  %249 = vperm.xlu0 %2339, %v28_v7  }
  0x1d   :  { %129 = vperm.xlu2 %2335, %v25_v6  }
  0x24   :  { %133 = vperm.xlu1 %2337, %v26_v2   ;;  %2342 = vset.pattern.permute.xlu0 %v2366_v11 }
  0x25   :  { %137 = vperm.xlu2 %2335, %v27_v5   ;;  %337 = vperm.xlu0 %2342, %v23_v4  }
  0x2c   :  { %145 = vperm.xlu1 %2337, %v29_v8  }
  0x2d   :  { %2338 = vset.pattern.permute.xlu2 %v2365_v10  ;;  %357 = vperm.xlu0 %2342, %v28_v7  }
  0x2e   :  { %225 = vperm.xlu2 %2338, %v22_v9  }
  0x34   :  { %2340 = vset.pattern.permute.xlu1 %v2365_v10 }
  0x35   :  { %233 = vperm.xlu1 %2340, %v24_v3   ;;  %2344 = vset.pattern.permute.xlu0 %v2364_v1 }
  0x36   :  { %237 = vperm.xlu2 %2338, %v25_v6   ;;  %32 = vperm.xlu0 %2344, %v22_v9  }
  0x3d   :  { %241 = vperm.xlu1 %2340, %v26_v2  }
  0x3e   :  { %245 = vperm.xlu2 %2338, %v27_v5   ;;  %37 = vperm.xlu0 %2344, %v23_v4  }
  0x45   :  { %253 = vperm.xlu1 %2340, %v29_v8  }
  0x46   :  { %2341 = vset.pattern.permute.xlu2 %v2366_v11  ;;  %62 = vperm.xlu0 %2344, %v28_v7  }
  0x47   :  { %333 = vperm.xlu2 %2341, %v22_v9  }
  0x4d   :  { %2343 = vset.pattern.permute.xlu1 %v2366_v11 }
  0x4e   :  { %341 = vperm.xlu1 %2343, %v24_v3   ;;  %455 = vperm.xlu0 %2344, %v441_v12  }
  0x4f   :  { %345 = vperm.xlu2 %2341, %v25_v6  }
  0x56   :  { %349 = vperm.xlu1 %2343, %v26_v2   ;;  %480 = vperm.xlu0 %2344, %v446_v13  }
  0x57   :  { %353 = vperm.xlu2 %2341, %v27_v5  }
  0x5c   :  { %v2432_v14 = vpop.permute.xlu2 %52 }
  0x5e   :  { %361 = vperm.xlu1 %2343, %v29_v8  }
  0x5f   :  { %2345 = vset.pattern.permute.xlu2 %v2364_v1 }
  0x60   :  { %450 = vperm.xlu2 %2345, %v440_v15  }
  0x64   :  { %v58_v16 = vpop.permute.xlu2 %57 }
  0x65   :  { %v104_v48 = vmul.f32 %v2480_v37, %v58_v16  ;;  %v105_v50 = vmul.f32 %v2482_v38, %v58_v16  ;;  %v106_v51 = vmul.f32 %v2484_v39, %v58_v16  ;;  %v107_v52 = vmul.f32 %v2486_v40, %v58_v16 }
  0x66   :  { %2346 = vset.pattern.permute.xlu1 %v2364_v1 }
  0x67   :  { %460 = vperm.xlu1 %2346, %v442_v17   ;;  %v100_v17 = vmul.f32 %v2480_v37, %v2432_v14 }
  0x68   :  { %465 = vperm.xlu2 %2345, %v443_v18   ;;  %v101_v18 = vmul.f32 %v2482_v38, %v2432_v14 }
  0x6e   :  { %v2451_v21 = vpop.permute.xlu2 %117 }
  0x6f   :  { %470 = vperm.xlu1 %2346, %v444_v19   ;;  %v102_v19 = vmul.f32 %v2484_v39, %v2432_v14 }
  0x70   :  { %475 = vperm.xlu2 %2345, %v445_v20   ;;  %v103_v20 = vmul.f32 %v2486_v40, %v2432_v14 }
  0x75   :  { %v43_v26 = vpop.permute.xlu1 %42  ;;  %v2467_v27 = vpop.permute.xlu0 %121 }
  0x76   :  { %v92_v1 = vmul.f32 %v2480_v37, %v43_v26  ;;  %v93_v2 = vmul.f32 %v2482_v38, %v43_v26  ;;  %v94_v3 = vmul.f32 %v2484_v39, %v43_v26  ;;  %v95_v4 = vmul.f32 %v2486_v40, %v43_v26 }
  0x77   :  { %v2470_v29 = vpop.permute.xlu2 %129  ;;  %485 = vperm.xlu1 %2346, %v447_v25  }
  0x78   :  { %v175_v41 = vmul.f32 %v2475_v33, %v2470_v29 }
  0x7d   :  { %v2496_v45 = vpop.permute.xlu1 %47  ;;  %v2498_v46 = vpop.permute.xlu0 %141 }
  0x7e   :  { %v99_v47 = vmul.f32 %v2486_v40, %v2496_v45 }
  0x7f   :  { %v138_v49 = vpop.permute.xlu2 %137 }
  0x80   :  { %v2506_v53 = vadd.f32 %v175_v41, %v99_v47  ;;  %v180_v54 = vmul.f32 %v2490_v42, %v138_v49  ;;  %v181_v55 = vmul.f32 %v2492_v43, %v138_v49  ;;  %v182_v56 = vmul.f32 %v2494_v44, %v138_v49 }
  0x81   :  { %v183_v57 = vmul.f32 %v2475_v33, %v138_v49 }
  0x82   :  { %4829 = vst [vmem:[#allocation2_spill] sm:$0xff] %v2506_v53  ;;  %v2512_v58 = vadd.f32 %v180_v54, %v104_v48  ;;  %v2514_v59 = vadd.f32 %v181_v55, %v105_v50  ;;  %v2516_v60 = vadd.f32 %v182_v56, %v106_v51 }
  0x83   :  { %v2518_v61 = vadd.f32 %v183_v57, %v107_v52  ;;  %v256_v57 = vperm.slane %v2461_v23, 2 }
  0x84   :  { %4830 = vst [vmem:[#allocation3_spill] sm:$0xff] %v2512_v58 }
  0x85   :  { %4831 = vst [vmem:[#allocation4_spill] sm:$0xff] %v2514_v59  ;;  %v68_v62 = vpop.permute.xlu1 %67 }
  0x86   :  { %4832 = vst [vmem:[#allocation5_spill] sm:$0xff] %v2516_v60  ;;  %v2520_v63 = vpop.permute.xlu0 %229  ;;  %v112_v41 = vmul.f32 %v2480_v37, %v68_v62  ;;  %v113_v47 = vmul.f32 %v2482_v38, %v68_v62  ;;  %v114_v48 = vmul.f32 %v2484_v39, %v68_v62  ;;  %v115_v49 = vmul.f32 %v2486_v40, %v68_v62 }
  0x87   :  { %4833 = vst [vmem:[#allocation6_spill] sm:$0xff] %v2518_v61 }
  0x88   :  { %v2522_v0 = vpop.permute.xlu2 %225 }
  0x8e   :  { %v126_v5 = vpop.permute.xlu1 %125  ;;  %v2528_v6 = vpop.permute.xlu0 %249 }
  0x8f   :  { %v168_v7 = vmul.f32 %v2490_v42, %v126_v5  ;;  %v169_v8 = vmul.f32 %v2492_v43, %v126_v5  ;;  %v170_v9 = vmul.f32 %v2494_v44, %v126_v5  ;;  %v171_v10 = vmul.f32 %v2475_v33, %v126_v5 }
  0x90   :  { %v2534_v11 = vpop.permute.xlu2 %237 }
  0x91   :  { %v2536_v12 = vadd.f32 %v168_v7, %v92_v1  ;;  %v2538_v13 = vadd.f32 %v169_v8, %v93_v2  ;;  %v2540_v15 = vadd.f32 %v170_v9, %v94_v3  ;;  %v2542_v16 = vadd.f32 %v171_v10, %v95_v4 }
  0x92   :  { %v257_v1 = vperm.slane %v2461_v23, 6  ;;  %v258_v2 = vperm.slane %v2456_v22, 2  ;;  %v259_v3 = vperm.slane %v2456_v22, 6  ;;  %v2592_v9 = vperm.slane %v256_v57, 2 }
  0x93   :  { %4834 = vst [vmem:[#allocation7_spill] sm:$0xff] %v2536_v12 }
  0x94   :  { %4835 = vst [vmem:[#allocation8_spill] sm:$0xff] %v2538_v13  ;;  %v2594_v10 = vperm.slane %v257_v1, 2  ;;  %v2646_v1 = vmul.f32 %v2490_v42, %v2498_v46 }
  0x95   :  { %4836 = vst [vmem:[#allocation9_spill] sm:$0xff] %v2540_v15 }
  0x96   :  { %4837 = vst [vmem:[#allocation10_spill] sm:$0xff] %v2542_v16  ;;  %v134_v24 = vpop.permute.xlu1 %133  ;;  %v292_v16 = vmul.f32 %v2592_v9, %v2528_v6  ;;  %v293_v15 = vmul.f32 %v2594_v10, %v2528_v6 }
  0x97   :  { %v176_v25 = vmul.f32 %v2490_v42, %v134_v24  ;;  %v177_v26 = vmul.f32 %v2492_v43, %v134_v24  ;;  %v178_v28 = vmul.f32 %v2494_v44, %v134_v24  ;;  %v179_v30 = vmul.f32 %v2475_v33, %v134_v24  ;;  %v2556_v31 = vpop.permute.xlu0 %337 }
  0x98   :  { %v2558_v32 = vpop.permute.xlu2 %245  ;;  %v162_v24 = vmul.f32 %v2494_v44, %v2451_v21 }
  0x99   :  { %v2560_v34 = vadd.f32 %v176_v25, %v100_v17  ;;  %v2562_v35 = vadd.f32 %v177_v26, %v101_v18  ;;  %v2564_v36 = vadd.f32 %v178_v28, %v102_v19  ;;  %v2566_v14 = vadd.f32 %v179_v30, %v103_v20 }
  0x9a   :  { %v2596_v17 = vperm.slane %v258_v2, 2  ;;  %v2598_v18 = vperm.slane %v259_v3, 2  ;;  %v160_v19 = vmul.f32 %v2490_v42, %v2451_v21  ;;  %v161_v20 = vmul.f32 %v2492_v43, %v2451_v21 }
  0x9b   :  { %4838 = vst [vmem:[#allocation11_spill] sm:$0xff] %v2560_v34  ;;  %v163_v25 = vmul.f32 %v2475_v33, %v2451_v21  ;;  %v172_v26 = vmul.f32 %v2490_v42, %v2470_v29  ;;  %v173_v28 = vmul.f32 %v2492_v43, %v2470_v29  ;;  %v96_v30 = vmul.f32 %v2480_v37, %v2496_v45 }
  0x9c   :  { %4839 = vst [vmem:[#allocation12_spill] sm:$0xff] %v2562_v35  ;;  %v98_v21 = vmul.f32 %v2484_v39, %v2496_v45  ;;  %v2650_v2 = vmul.f32 %v2492_v43, %v2498_v46  ;;  %v271_v34 = vmul.f32 %v2598_v18, %v2522_v0  ;;  %v294_v13 = vmul.f32 %v2596_v17, %v2528_v6 }
  0x9d   :  { %4840 = vst [vmem:[#allocation13_spill] sm:$0xff] %v2564_v36  ;;  %v204_v3 = vadd.f32 %v172_v26, %v96_v30  ;;  %v2671_v26 = vmul.f32 %v2594_v10, %v2520_v63 }
  0x9e   :  { %4841 = vst [vmem:[#allocation14_spill] sm:$0xff] %v2566_v14  ;;  %v146_v50 = vpop.permute.xlu1 %145 }
  0x9f   :  { %v188_v51 = vmul.f32 %v2490_v42, %v146_v50  ;;  %v189_v52 = vmul.f32 %v2492_v43, %v146_v50  ;;  %v190_v54 = vmul.f32 %v2494_v44, %v146_v50  ;;  %v191_v55 = vmul.f32 %v2475_v33, %v146_v50  ;;  %v2576_v56 = vpop.permute.xlu0 %357  ;;  %4847 = vst [vmem:[#allocation20_spill] sm:$0xff] %v2598_v18 }
  0xa0   :  { %4842 = vst [vmem:[#allocation15_spill] sm:$0xff] %v2576_v56  ;;  %v365_v50 = vperm.slane %v2461_v23, 7 }
  0xa1   :  { %v2582_v62 = vadd.f32 %v188_v51, %v112_v41  ;;  %v2584_v4 = vadd.f32 %v189_v52, %v113_v47  ;;  %v2586_v5 = vadd.f32 %v190_v54, %v114_v48  ;;  %v2588_v7 = vadd.f32 %v191_v55, %v115_v49  ;;  %v2590_v8 = vpop.permute.xlu2 %333 }
  0xa2   :  { %v97_v41 = vmul.f32 %v2482_v38, %v2496_v45  ;;  %v174_v48 = vmul.f32 %v2494_v44, %v2470_v29  ;;  %v364_v49 = vperm.slane %v2461_v23, 3  ;;  %v2626_v52 = vmul.f32 %v2490_v42, %v2467_v27 }
  0xa3   :  { %4843 = vst [vmem:[#allocation16_spill] sm:$0xff] %v2582_v62  ;;  %v2630_v54 = vmul.f32 %v2492_v43, %v2467_v27  ;;  %v366_v55 = vperm.slane %v2456_v22, 3  ;;  %v367_v29 = vperm.slane %v2456_v22, 7  ;;  %v2638_v45 = vmul.f32 %v2494_v44, %v2467_v27 }
  0xa4   :  { %4844 = vst [vmem:[#allocation17_spill] sm:$0xff] %v2584_v4  ;;  %v2642_v23 = vmul.f32 %v2475_v33, %v2467_v27  ;;  %v205_v22 = vadd.f32 %v173_v28, %v97_v41  ;;  %v206_v27 = vadd.f32 %v174_v48, %v98_v21  ;;  %v2660_v4 = vperm.slane %v364_v49, 3 }
  0xa5   :  { %4845 = vst [vmem:[#allocation18_spill] sm:$0xff] %v2586_v5  ;;  %v2658_v5 = vmul.f32 %v2475_v33, %v2498_v46  ;;  %v2662_v62 = vperm.slane %v365_v50, 3  ;;  %v2667_v43 = vmul.f32 %v2592_v9, %v2520_v63  ;;  %v2675_v28 = vperm.slane %v367_v29, 3 }
  0xa6   :  { %4846 = vst [vmem:[#allocation19_spill] sm:$0xff] %v2588_v7  ;;  %v2654_v7 = vmul.f32 %v2494_v44, %v2498_v46  ;;  %v2673_v44 = vperm.slane %v366_v55, 3  ;;  %v2679_v33 = vmul.f32 %v2596_v17, %v2520_v63  ;;  %v2683_v46 = vmul.f32 %v2598_v18, %v2520_v63 }
  0xa7   :  { %v2616_v47 = vpop.permute.xlu1 %233  ;;  %4849 = vst [vmem:[#allocation22_spill] sm:$0xff] %v2662_v62  ;;  %v268_v48 = vmul.f32 %v2592_v9, %v2522_v0  ;;  %v280_v21 = vmul.f32 %v2592_v9, %v2534_v11  ;;  %v281_v49 = vmul.f32 %v2594_v10, %v2534_v11  ;;  %v282_v50 = vmul.f32 %v2596_v17, %v2534_v11 }
  0xa8   :  { %4848 = vst [vmem:[#allocation21_spill] sm:$0xff] %v2616_v47  ;;  %v33_v51 = vpop.permute.xlu0 %32  ;;  %v269_v63 = vmul.f32 %v2594_v10, %v2522_v0  ;;  %v270_v29 = vmul.f32 %v2596_v17, %v2522_v0  ;;  %v376_v60 = vmul.f32 %v2660_v4, %v2590_v8 }
  0xa9   :  { %v2634_v57 = vpop.permute.xlu2 %345  ;;  %v84_v42 = vmul.f32 %v2480_v37, %v33_v51  ;;  %v85_v30 = vmul.f32 %v2482_v38, %v33_v51  ;;  %v86_v41 = vmul.f32 %v2484_v39, %v33_v51  ;;  %v87_v14 = vmul.f32 %v2486_v40, %v33_v51 }
  0xaa   :  { %v2720_v47 = vadd.f32 %v281_v49, %v205_v22  ;;  %v2722_v61 = vadd.f32 %v282_v50, %v206_v27 }
  0xab   :  { %v192_v36 = vadd.f32 %v160_v19, %v84_v42  ;;  %v295_v19 = vmul.f32 %v2598_v18, %v2528_v6  ;;  %v193_v51 = vadd.f32 %v161_v20, %v85_v30  ;;  %v194_v0 = vadd.f32 %v162_v24, %v86_v41 }
  0xac   :  { %v2718_v42 = vadd.f32 %v280_v21, %v204_v3  ;;  %v195_v59 = vadd.f32 %v163_v25, %v87_v14  ;;  %v380_v6 = vmul.f32 %v2660_v4, %v2556_v31  ;;  %v381_v20 = vmul.f32 %v2662_v62, %v2556_v31 }
  0xad   :  { %v377_v24 = vmul.f32 %v2662_v62, %v2590_v8  ;;  %v378_v3 = vmul.f32 %v2673_v44, %v2590_v8  ;;  %v301_v25 = vadd.f32 %v269_v63, %v193_v51  ;;  %v302_v27 = vadd.f32 %v270_v29, %v194_v0 }
  0xae   :  { %v379_v30 = vmul.f32 %v2675_v28, %v2590_v8  ;;  %v388_v41 = vmul.f32 %v2660_v4, %v2634_v57  ;;  %v303_v63 = vadd.f32 %v271_v34, %v195_v59 }
  0xaf   :  { %v2695_v55 = vpop.permute.xlu1 %241 }
  0xb0   :  { %4850 = vst [vmem:[#allocation23_spill] sm:$0xff] %v2695_v55  ;;  %v38_v35 = vpop.permute.xlu0 %37  ;;  %v2714_v55 = vmul.f32 %v2598_v18, %v2534_v11 }
  0xb1   :  { %v2710_v12 = vpop.permute.xlu2 %353  ;;  %v88_v58 = vmul.f32 %v2480_v37, %v38_v35  ;;  %v89_v11 = vmul.f32 %v2482_v38, %v38_v35  ;;  %v90_v22 = vmul.f32 %v2484_v39, %v38_v35  ;;  %v91_v14 = vmul.f32 %v2486_v40, %v38_v35 }
  0xb2   :  { %4851 = vst [vmem:[#allocation24_spill] sm:$0xff] %v2714_v55  ;;  %v300_v55 = vadd.f32 %v268_v48, %v192_v36  ;;  %v403_v36 = vmul.f32 %v2675_v28, %v2576_v56  ;;  %v389_v48 = vmul.f32 %v2662_v62, %v2634_v57  ;;  %v409_v62 = vadd.f32 %v377_v24, %v301_v25 }
  0xb3   :  { %v196_v49 = vadd.f32 %v2626_v52, %v88_v58  ;;  %v197_v35 = vadd.f32 %v2630_v54, %v89_v11  ;;  %v198_v18 = vadd.f32 %v2638_v45, %v90_v22  ;;  %v199_v53 = vadd.f32 %v2642_v23, %v91_v14 }
  0xb4   :  { %v408_v29 = vadd.f32 %v376_v60, %v300_v55  ;;  %v410_v58 = vadd.f32 %v378_v3, %v302_v27  ;;  %v420_v24 = vadd.f32 %v388_v41, %v2718_v42  ;;  %v421_v3 = vadd.f32 %v389_v48, %v2720_v47 }
  0xb5   :  { %v305_v34 = vadd.f32 %v2671_v26, %v197_v35  ;;  %v307_v55 = vadd.f32 %v2683_v46, %v199_v53  ;;  %v290_v48 = vmul.f32 %v2596_v17, %v2558_v32  ;;  %v4855_v35 = vld [vmem:[#allocation2_spill] sm:$0xff] }
  0xb7   :  { %v2746_v21 = vpop.permute.xlu1 %253  ;;  %v413_v11 = vadd.f32 %v381_v20, %v305_v34 }
  0xb8   :  { %4852 = vst [vmem:[#allocation25_spill] sm:$0xff] %v2746_v21  ;;  %v63_v50 = vpop.permute.xlu0 %62 }
  0xb9   :  { %v108_v51 = vmul.f32 %v2480_v37, %v63_v50  ;;  %v109_v0 = vmul.f32 %v2482_v38, %v63_v50  ;;  %v110_v8 = vmul.f32 %v2484_v39, %v63_v50  ;;  %v111_v56 = vmul.f32 %v2486_v40, %v63_v50  ;;  %v4856_v50 = vld [vmem:[#allocation24_spill] sm:$0xff] }
  0xba   :  { %v451_v21 = vpop.permute.xlu2 %450  ;;  %v304_v40 = vadd.f32 %v2667_v43, %v196_v49 }
  0xbb   :  { %v216_v52 = vadd.f32 %v2646_v1, %v108_v51  ;;  %v217_v59 = vadd.f32 %v2650_v2, %v109_v0  ;;  %v218_v60 = vadd.f32 %v2654_v7, %v110_v8  ;;  %v219_v37 = vadd.f32 %v2658_v5, %v111_v56  ;;  %v4857_v8 = vld [vmem:[#allocation3_spill] sm:$0xff] }
  0xbc   :  { %v2760_v38 = vadd.f32 %v451_v21, %v408_v29  ;;  %v2762_v39 = vadd.f32 %v451_v21, %v409_v62  ;;  %v382_v7 = vmul.f32 %v2673_v44, %v2556_v31  ;;  %v2774_v2 = vadd.f32 %v451_v21, %v410_v58 }
  0xbd   :  { %v2766_v54 = vadd.f32 %v292_v16, %v216_v52  ;;  %v2768_v45 = vadd.f32 %v293_v15, %v217_v59  ;;  %v2770_v23 = vadd.f32 %v294_v13, %v218_v60  ;;  %v327_v1 = vadd.f32 %v295_v19, %v219_v37  ;;  %v4858_v52 = vld [vmem:[#allocation4_spill] sm:$0xff] }
  0xbe   :  { %v306_v56 = vadd.f32 %v2679_v33, %v198_v18  ;;  %v520_v62 = vadd.f32 %v2762_v39, %v2760_v38  ;;  %v383_v5 = vmul.f32 %v2675_v28, %v2556_v31  ;;  %v390_v15 = vmul.f32 %v2673_v44, %v2634_v57  ;;  %v4859_v37 = vld [vmem:[#allocation20_spill] sm:$0xff] }
  0xbf   :  { %v411_v16 = vadd.f32 %v379_v30, %v303_v63  ;;  %v2783_v13 = vadd.f32 %v403_v36, %v327_v1  ;;  %v412_v19 = vadd.f32 %v380_v6, %v304_v40  ;;  %v288_v33 = vmul.f32 %v2592_v9, %v2558_v32 }
  0xc0   :  { %v2785_v43 = vpop.permute.xlu1 %341  ;;  %v456_v26 = vpop.permute.xlu0 %455  ;;  %v521_v18 = vadd.f32 %v520_v62, %v2774_v2  ;;  %v289_v31 = vmul.f32 %v2594_v10, %v2558_v32  ;;  %v414_v14 = vadd.f32 %v382_v7, %v306_v56  ;;  %v391_v6 = vmul.f32 %v2675_v28, %v2634_v57  ;;  %v4860_v62 = vld [vmem:[#allocation5_spill] sm:$0xff] }
  0xc1   :  { %v2795_v22 = vadd.f32 %v451_v21, %v411_v16  ;;  %v2797_v25 = vadd.f32 %v456_v26, %v412_v19  ;;  %v2799_v53 = vadd.f32 %v456_v26, %v413_v11  ;;  %v422_v20 = vadd.f32 %v390_v15, %v2722_v61  ;;  %v4854_v61 = vld [vmem:[#allocation22_spill] sm:$0xff] }
  0xc2   :  { %v466_v46 = vpop.permute.xlu2 %465  ;;  %v415_v42 = vadd.f32 %v383_v5, %v307_v55  ;;  %v2808_v30 = vadd.f32 %v456_v26, %v414_v14  ;;  %v396_v57 = vmul.f32 %v2660_v4, %v2710_v12  ;;  %v397_v21 = vmul.f32 %v4854_v61, %v2710_v12 }
  0xc3   :  { %v2804_v27 = vadd.f32 %v466_v46, %v420_v24  ;;  %v2806_v36 = vadd.f32 %v466_v46, %v421_v3  ;;  %v522_v47 = vadd.f32 %v521_v18, %v2795_v22  ;;  %v525_v41 = vadd.f32 %v2799_v53, %v2797_v25 }
  0xc4   :  { %v315_v63 = vadd.f32 %v4856_v50, %v4855_v35  ;;  %v2823_v29 = vadd.f32 %v456_v26, %v415_v42  ;;  %v2825_v51 = vadd.f32 %v466_v46, %v422_v20  ;;  %v320_v58 = vadd.f32 %v288_v33, %v4857_v8  ;;  %v4862_v33 = vld [vmem:[#allocation6_spill] sm:$0xff]  ;;  %v4863_v42 = vld [vmem:[#allocation21_spill] sm:$0xff] }
  0xc5   :  { %4853 = vst [vmem:[#allocation26_spill] sm:$0xff] %v2806_v36  ;;  %v535_v49 = vadd.f32 %v2806_v36, %v2804_v27  ;;  %523 = vadd.xlane.f32.xlu2 %v522_v47  ;;  %v526_v0 = vadd.f32 %v525_v41, %v2808_v30  ;;  %v321_v59 = vadd.f32 %v289_v31, %v4858_v52  ;;  %v4865_v52 = vld [vmem:[#allocation23_spill] sm:$0xff] }
  0xc6   :  { %v398_v60 = vmul.f32 %v2673_v44, %v2710_v12  ;;  %v291_v40 = vmul.f32 %v4859_v37, %v2558_v32  ;;  %v423_v34 = vadd.f32 %v391_v6, %v315_v63  ;;  %v322_v5 = vadd.f32 %v290_v48, %v4860_v62 }
  0xc7   :  { %v527_v7 = vadd.f32 %v526_v0, %v2823_v29  ;;  %v536_v56 = vadd.f32 %v535_v49, %v2825_v51  ;;  %v428_v15 = vadd.f32 %v396_v57, %v320_v58  ;;  %v429_v16 = vadd.f32 %v397_v21, %v321_v59  ;;  %v4864_v57 = vld [vmem:[#allocation15_spill] sm:$0xff] }
  0xc8   :  { %v2834_v1 = vpop.permute.xlu1 %349  ;;  %v399_v26 = vmul.f32 %v2675_v28, %v2710_v12  ;;  %v2841_v55 = vadd.f32 %v466_v46, %v423_v34  ;;  %v430_v11 = vadd.f32 %v398_v60, %v322_v5  ;;  %v323_v31 = vadd.f32 %v291_v40, %v4862_v33  ;;  %v4866_v40 = vld [vmem:[#allocation7_spill] sm:$0xff]  ;;  %v4868_v33 = vld [vmem:[#allocation9_spill] sm:$0xff] }
  0xc9   :  { %528 = vadd.xlane.f32.xlu0 %v527_v7  ;;  %v568_v12 = vmul.f32 %v2760_v38, %v2760_v38  ;;  %v569_v46 = vmul.f32 %v2762_v39, %v2762_v39  ;;  %v276_v47 = vmul.f32 %v2592_v9, %v4863_v42  ;;  %v400_v21 = vmul.f32 %v2660_v4, %v4864_v57 }
  0xca   :  { %v476_v19 = vpop.permute.xlu2 %475  ;;  %v537_v24 = vadd.f32 %v536_v56, %v2841_v55  ;;  %v431_v6 = vadd.f32 %v399_v26, %v323_v31  ;;  %v277_v35 = vmul.f32 %v2594_v10, %v4863_v42  ;;  %v278_v50 = vmul.f32 %v2596_v17, %v4863_v42 }
  0xcb   :  { %v2843_v32 = vadd.f32 %v476_v19, %v428_v15  ;;  %v2845_v18 = vadd.f32 %v476_v19, %v429_v16  ;;  %v2849_v3 = vadd.f32 %v476_v19, %v430_v11  ;;  %v600_v49 = vadd.f32 %v569_v46, %v568_v12 }
  0xcc   :  { %v2860_v41 = vadd.f32 %v476_v19, %v431_v6  ;;  %v279_v63 = vmul.f32 %v4859_v37, %v4863_v42  ;;  %v401_v8 = vmul.f32 %v4854_v61, %v4864_v57  ;;  %v402_v58 = vmul.f32 %v2673_v44, %v4864_v57  ;;  %v4867_v19 = vld [vmem:[#allocation8_spill] sm:$0xff]  ;;  %v4870_v6 = vld [vmem:[#allocation11_spill] sm:$0xff] }
  0xcd   :  { %4861 = vst [vmem:[#allocation22_spill] sm:$0xff] %v2845_v18  ;;  %v545_v14 = vadd.f32 %v2845_v18, %v2843_v32  ;;  %538 = vadd.xlane.f32.xlu2 %v537_v24  ;;  %v284_v59 = vmul.f32 %v2592_v9, %v4865_v52  ;;  %v570_v60 = vmul.f32 %v2774_v2, %v2774_v2  ;;  %v4869_v24 = vld [vmem:[#allocation10_spill] sm:$0xff] }
  0xce   :  { %v308_v34 = vadd.f32 %v276_v47, %v4866_v40  ;;  %v285_v7 = vmul.f32 %v2594_v10, %v4865_v52  ;;  %v384_v56 = vmul.f32 %v2660_v4, %v2785_v43  ;;  %v385_v62 = vmul.f32 %v4854_v61, %v2785_v43  ;;  %v481_v47 = vpop.permute.xlu0 %480 }
  0xcf   :  { %v546_v20 = vadd.f32 %v545_v14, %v2849_v3  ;;  %v386_v5 = vmul.f32 %v2673_v44, %v2785_v43  ;;  %v601_v15 = vadd.f32 %v600_v49, %v570_v60  ;;  %v580_v16 = vmul.f32 %v2804_v27, %v2804_v27 }
  0xd0   :  { %v2862_v48 = vpop.permute.xlu1 %361  ;;  %v581_v26 = vmul.f32 %v2806_v36, %v2806_v36  ;;  %v309_v11 = vadd.f32 %v277_v35, %v4867_v19  ;;  %v310_v31 = vadd.f32 %v278_v50, %v4868_v33  ;;  %v311_v14 = vadd.f32 %v279_v63, %v4869_v24  ;;  %v4873_v36 = vld [vmem:[#allocation13_spill] sm:$0xff] }
  0xd1   :  { %v547_v0 = vadd.f32 %v546_v20, %v2860_v41  ;;  %v286_v12 = vmul.f32 %v2596_v17, %v4865_v52  ;;  %v287_v46 = vmul.f32 %v4859_v37, %v4865_v52  ;;  %v316_v20 = vadd.f32 %v284_v59, %v4870_v6 }
  0xd2   :  { %v387_v42 = vmul.f32 %v2675_v28, %v2785_v43  ;;  %v571_v57 = vmul.f32 %v2795_v22, %v2795_v22  ;;  %v432_v49 = vadd.f32 %v400_v21, %v2766_v54  ;;  %v433_v35 = vadd.f32 %v401_v8, %v2768_v45  ;;  %v4874_v21 = vld [vmem:[#allocation14_spill] sm:$0xff] }
  0xd3   :  { %548 = vadd.xlane.f32.xlu0 %v547_v0  ;;  %v416_v50 = vadd.f32 %v384_v56, %v308_v34  ;;  %v417_v63 = vadd.f32 %v385_v62, %v309_v11  ;;  %v4871_v0 = vld [vmem:[#allocation12_spill] sm:$0xff]  ;;  %v418_v19 = vadd.f32 %v386_v5, %v310_v31  ;;  %v615_v33 = vadd.f32 %v581_v26, %v580_v16 }
  0xd4   :  { %v317_v60 = vadd.f32 %v285_v7, %v4871_v0  ;;  %v602_v52 = vadd.f32 %v601_v15, %v571_v57  ;;  %v2909_v59 = vadd.f32 %v481_v47, %v432_v49  ;;  %v2911_v24 = vadd.f32 %v481_v47, %v433_v35  ;;  %v4875_v15 = vld [vmem:[#allocation25_spill] sm:$0xff] }
  0xd5   :  { %v318_v54 = vadd.f32 %v286_v12, %v4873_v36  ;;  %v319_v45 = vadd.f32 %v287_v46, %v4874_v21  ;;  %v419_v8 = vadd.f32 %v387_v42, %v311_v14  ;;  %v582_v34 = vmul.f32 %v2825_v51, %v2825_v51 }
  0xd6   :  { %4872 = vst [vmem:[#allocation2_spill] sm:$0xff] %v2911_v24  ;;  %v392_v7 = vmul.f32 %v2660_v4, %v2834_v1  ;;  %v393_v56 = vmul.f32 %v4854_v61, %v2834_v1  ;;  %v296_v36 = vmul.f32 %v2592_v9, %v4875_v15  ;;  %v394_v16 = vmul.f32 %v2673_v44, %v2834_v1 }
  0xd7   :  { %v434_v26 = vadd.f32 %v402_v58, %v2770_v23  ;;  %v616_v11 = vadd.f32 %v615_v33, %v582_v34  ;;  %v592_v12 = vmul.f32 %v2909_v59, %v2909_v59  ;;  %v593_v46 = vmul.f32 %v2911_v24, %v2911_v24 }
  0xd8   :  { %v297_v42 = vmul.f32 %v2594_v10, %v4875_v15  ;;  %v395_v9 = vmul.f32 %v2675_v28, %v2834_v1  ;;  %v550_v23 = vadd.f32 %v2911_v24, %v2909_v59  ;;  %v424_v58 = vadd.f32 %v392_v7, %v316_v20 }
  0xd9   :  { %v461_v40 = vpop.permute.xlu1 %460  ;;  %v2945_v57 = vadd.f32 %v481_v47, %v434_v26  ;;  %v425_v49 = vadd.f32 %v393_v56, %v317_v60  ;;  %v426_v10 = vadd.f32 %v394_v16, %v318_v54  ;;  %v572_v1 = vmul.f32 %v2797_v25, %v2797_v25 }
  0xda   :  { %v2913_v43 = vadd.f32 %v461_v40, %v416_v50  ;;  %v2915_v6 = vadd.f32 %v461_v40, %v417_v63  ;;  %v2925_v62 = vadd.f32 %v461_v40, %v418_v19  ;;  %v2934_v31 = vadd.f32 %v461_v40, %v419_v8 }
  0xdb   :  { %603 = vadd.xlane.f32.xlu0 %v602_v52  ;;  %4876 = vst [vmem:[#allocation24_spill] sm:$0xff] %v2945_v57  ;;  %v583_v50 = vmul.f32 %v2841_v55, %v2841_v55  ;;  %v298_v63 = vmul.f32 %v2596_v17, %v4875_v15  ;;  %v573_v40 = vmul.f32 %v2799_v53, %v2799_v53 }
  0xdc   :  { %v530_v5 = vadd.f32 %v2915_v6, %v2913_v43  ;;  %v630_v52 = vadd.f32 %v593_v46, %v592_v12  ;;  %v2963_v33 = vadd.f32 %v481_v47, %v2783_v13  ;;  %v427_v21 = vadd.f32 %v395_v9, %v319_v45  ;;  %v4877_v47 = vld [vmem:[#allocation16_spill] sm:$0xff] }
  0xdd   :  { %v617_v60 = vadd.f32 %v616_v11, %v583_v50  ;;  %v551_v17 = vadd.f32 %v550_v23, %v2945_v57  ;;  %v594_v54 = vmul.f32 %v2945_v57, %v2945_v57  ;;  %v404_v8 = vmul.f32 %v2660_v4, %v2862_v48  ;;  %v4880_v23 = vld [vmem:[#allocation19_spill] sm:$0xff] }
  0xde   :  { %v531_v14 = vadd.f32 %v530_v5, %v2925_v62  ;;  %v405_v34 = vmul.f32 %v4854_v61, %v2862_v48  ;;  %v299_v13 = vmul.f32 %v4859_v37, %v4875_v15  ;;  %v328_v45 = vadd.f32 %v296_v36, %v4877_v47  ;;  %v4878_v5 = vld [vmem:[#allocation17_spill] sm:$0xff] }
  0xdf   :  { %v329_v16 = vadd.f32 %v297_v42, %v4878_v5  ;;  %v406_v26 = vmul.f32 %v2673_v44, %v2862_v48  ;;  %v631_v11 = vadd.f32 %v630_v52, %v594_v54  ;;  %v407_v46 = vmul.f32 %v2675_v28, %v2862_v48 }
  0xe0   :  { %v532_v35 = vadd.f32 %v531_v14, %v2934_v31  ;;  %v4879_v14 = vld [vmem:[#allocation18_spill] sm:$0xff]  ;;  %v595_v37 = vmul.f32 %v2963_v33, %v2963_v33  ;;  %v605_v15 = vadd.f32 %v573_v40, %v572_v1  ;;  %v436_v36 = vadd.f32 %v404_v8, %v328_v45 }
  0xe1   :  { %v471_v0 = vpop.permute.xlu1 %470  ;;  %v330_v12 = vadd.f32 %v298_v63, %v4879_v14  ;;  %v437_v9 = vadd.f32 %v405_v34, %v329_v16  ;;  %v552_v42 = vadd.f32 %v551_v17, %v2963_v33  ;;  %v577_v17 = vmul.f32 %v2915_v6, %v2915_v6 }
  0xe2   :  { %v2958_v19 = vadd.f32 %v471_v0, %v424_v58  ;;  %v2960_v20 = vadd.f32 %v471_v0, %v425_v49  ;;  %533 = vadd.xlane.f32.xlu1 %v532_v35  ;;  %v2972_v7 = vadd.f32 %v471_v0, %v426_v10  ;;  %v2982_v4 = vadd.f32 %v471_v0, %v427_v21 }
  0xe3   :  { %618 = vadd.xlane.f32.xlu0 %v617_v60  ;;  %v331_v58 = vadd.f32 %v299_v13, %v4880_v23  ;;  %v574_v35 = vmul.f32 %v2808_v30, %v2808_v30  ;;  %v438_v50 = vadd.f32 %v406_v26, %v330_v12  ;;  %v632_v48 = vadd.f32 %v631_v11, %v595_v37 }
  0xe4   :  { %v540_v56 = vadd.f32 %v2960_v20, %v2958_v19  ;;  %v584_v60 = vmul.f32 %v2958_v19, %v2958_v19  ;;  %v585_v52 = vmul.f32 %v2960_v20, %v2960_v20  ;;  %v576_v21 = vmul.f32 %v2913_v43, %v2913_v43 }
  0xe5   :  { %v439_v0 = vadd.f32 %v407_v46, %v331_v58  ;;  %v606_v10 = vadd.f32 %v605_v15, %v574_v35  ;;  %v575_v8 = vmul.f32 %v2823_v29, %v2823_v29  ;;  %v586_v5 = vmul.f32 %v2972_v7, %v2972_v7 }
  0xe6   :  { %v541_v61 = vadd.f32 %v540_v56, %v2972_v7  ;;  %v620_v47 = vadd.f32 %v585_v52, %v584_v60  ;;  %v610_v45 = vadd.f32 %v577_v17, %v576_v21  ;;  %v578_v16 = vmul.f32 %v2925_v62, %v2925_v62 }
  0xe7   :  { %v607_v56 = vadd.f32 %v606_v10, %v575_v8  ;;  %v588_v12 = vmul.f32 %v2843_v32, %v2843_v32  ;;  %v589_v46 = vmul.f32 %v2845_v18, %v2845_v18  ;;  %v587_v37 = vmul.f32 %v2982_v4, %v2982_v4 }
  0xe8   :  { %v542_v44 = vadd.f32 %v541_v61, %v2982_v4  ;;  %v621_v26 = vadd.f32 %v620_v47, %v586_v5  ;;  %v611_v14 = vadd.f32 %v610_v45, %v578_v16  ;;  %v579_v15 = vmul.f32 %v2934_v31, %v2934_v31 }
  0xe9   :  { %v486_v49 = vpop.permute.xlu1 %485  ;;  %v590_v58 = vmul.f32 %v2849_v3, %v2849_v3 }
  0xea   :  { %v2995_v63 = vadd.f32 %v486_v49, %v436_v36  ;;  %v2997_v28 = vadd.f32 %v486_v49, %v437_v9  ;;  %553 = vadd.xlane.f32.xlu1 %v552_v42  ;;  %543 = vadd.xlane.f32.xlu2 %v542_v44  ;;  %v2999_v1 = vadd.f32 %v486_v49, %v438_v50 }
  0xeb   :  { %633 = vadd.xlane.f32.xlu0 %v632_v48  ;;  %v3011_v54 = vadd.f32 %v486_v49, %v439_v0  ;;  %v622_v36 = vadd.f32 %v621_v26, %v587_v37  ;;  %v612_v42 = vadd.f32 %v611_v14, %v579_v15  ;;  %v625_v44 = vadd.f32 %v589_v46, %v588_v12 }
  0xec   :  { %4881 = vst [vmem:[#allocation3_spill] sm:$0xff] %v2997_v28  ;;  %v555_v40 = vadd.f32 %v2997_v28, %v2995_v63  ;;  %v596_v11 = vmul.f32 %v2995_v63, %v2995_v63  ;;  %v597_v61 = vmul.f32 %v2997_v28, %v2997_v28  ;;  %v598_v23 = vmul.f32 %v2999_v1, %v2999_v1 }
  0xed   :  { %4882 = vst [vmem:[#allocation4_spill] sm:$0xff] %v2999_v1  ;;  %v626_v35 = vadd.f32 %v625_v44, %v590_v58  ;;  %v599_v50 = vmul.f32 %v3011_v54, %v3011_v54  ;;  %v591_v48 = vmul.f32 %v2860_v41, %v2860_v41 }
  0xee   :  { %v556_v34 = vadd.f32 %v555_v40, %v2999_v1  ;;  %v635_v9 = vadd.f32 %v597_v61, %v596_v11 }
  0xef   :  { %v627_v10 = vadd.f32 %v626_v35, %v591_v48  ;;  %v664_v48 = vld [vmem:[%s4748_s3] sm:$0xff] }
  0xf0   :  { %v557_v13 = vadd.f32 %v556_v34, %v3011_v54  ;;  %v636_v49 = vadd.f32 %v635_v9, %v598_v23 }
  0xf2   :  { %608 = vadd.xlane.f32.xlu1 %v607_v56  ;;  %558 = vadd.xlane.f32.xlu2 %v557_v13  ;;  %v637_v0 = vadd.f32 %v636_v49, %v599_v50 }
  0xfa   :  { %623 = vadd.xlane.f32.xlu1 %v622_v36  ;;  %613 = vadd.xlane.f32.xlu2 %v612_v42 }
 0x102   :  { %638 = vadd.xlane.f32.xlu1 %v637_v0  ;;  %628 = vadd.xlane.f32.xlu2 %v627_v10 }
 0x138   :  { %v524_v52 = vpop.xlane.xlu2 %523 }
 0x139   :  { %v3043_v21 = vmul.f32 0.001953125, %v524_v52 }
 0x13b   :  { %v648_v8 = vmul.f32 %v3043_v21, %v3043_v21 }
 0x13c   :  { %v529_v40 = vpop.xlane.xlu0 %528 }
 0x13d   :  { %v3055_v23 = vmul.f32 0.001953125, %v529_v40 }
 0x13f   :  { %v649_v10 = vmul.f32 %v3055_v23, %v3055_v23 }
 0x140   :  { %v539_v13 = vpop.xlane.xlu2 %538 }
 0x141   :  { %v3047_v5 = vmul.f32 0.001953125, %v539_v13 }
 0x143   :  { %v651_v11 = vmul.f32 %v3047_v5, %v3047_v5 }
 0x146   :  { %v3041_v60 = vpop.xlane.xlu0 %548 }
 0x14e   :  { %v604_v17 = vpop.xlane.xlu0 %603 }
 0x14f   :  { %v640_v34 = vmul.f32 0.001953125, %v604_v17 }
 0x151   :  { %v656_v56 = vsub.f32 %v640_v34, %v648_v8 }
 0x153   :  { %v672_v47 = vadd.f32 1e-05, %v656_v56 }
 0x155   :  { %v534_v45 = vpop.xlane.xlu1 %533  ;;  %2347 = vrsqrt.f32 %v672_v47  ;;  %vm686_vm1 = vweird.f32 %v672_v47 }
 0x156   :  { %v619_v16 = vpop.xlane.xlu0 %618 }
 0x157   :  { %v643_v26 = vmul.f32 0.001953125, %v619_v16 }
 0x159   :  { %v659_v12 = vsub.f32 %v643_v26, %v651_v11  ;;  %v3074_v11 = vmul.f32 0.001953125, %v534_v45 }
 0x15b   :  { %v2348_v61 = vpop.eup %2347  ;;  %v3053_v42 = vadd.f32 1e-05, %v659_v12 }
 0x15c   :  { %v681_v14 = vmul.f32 %v2348_v61, %v672_v47  ;;  %vm687_vm0 = vweird.f32 %v2348_v61 }
 0x15d   :  { %v554_v46 = vpop.xlane.xlu1 %553  ;;  %v544_v15 = vpop.xlane.xlu2 %543  ;;  %2349 = vrsqrt.f32 %v3053_v42  ;;  %vm688_vm2 = vmor %vm686_vm1, %vm687_vm0  ;;  %vm716_vm7 = vweird.f32 %v3053_v42 }
 0x15e   :  { %v3051_v37 = vmul.f32 0.001953125, %v554_v46  ;;  %v682_v36 = vmul.f32 %v2348_v61, %v681_v14  ;;  %v634_v44 = vpop.xlane.xlu0 %633  ;;  %v3069_v47 = vmul.f32 0.001953125, %v544_v15 }
 0x15f   :  { %v646_v35 = vmul.f32 0.001953125, %v634_v44 }
 0x160   :  { %v683_v9 = vmul.f32 0.5, %v682_v36  ;;  %v654_v58 = vmul.f32 %v3051_v37, %v3051_v37  ;;  %v650_v36 = vmul.f32 %v3074_v11, %v3074_v11 }
 0x162   :  { %v684_v49 = vsub.f32 1.5, %v683_v9  ;;  %v662_v40 = vsub.f32 %v646_v35, %v654_v58 }
 0x163   :  { %v3072_v26 = vpop.eup %2349 }
 0x164   :  { %v685_v0 = vmul.f32 %v2348_v61, %v684_v49  ;;  %v3067_v13 = vadd.f32 1e-05, %v662_v40  ;;  %v711_v12 = vmul.f32 %v3072_v26, %v3053_v42  ;;  %vm717_vm6 = vweird.f32 %v3072_v26 }
 0x165   :  { %v609_v50 = vpop.xlane.xlu1 %608  ;;  %v559_v17 = vpop.xlane.xlu2 %558  ;;  %vm3117_vm8 = vmor %vm716_vm7, %vm717_vm6 }
 0x166   :  { %v641_v52 = vmul.f32 0.001953125, %v609_v50  ;;  %v689_v8 = vsel %vm688_vm2, %v2348_v61, %v685_v0  ;;  %v652_v61 = vmul.f32 %v3069_v47, %v3069_v47  ;;  %v712_v49 = vmul.f32 %v3072_v26, %v711_v12 }
 0x167   :  { %v3065_v56 = vmul.f32 %v689_v8, %v664_v48  ;;  %v3084_v35 = vmul.f32 0.001953125, %v559_v17  ;;  %v3087_v48 = vmul.f32 0.001953125, %v3041_v60  ;;  %vm746_vm0 = vweird.f32 %v3067_v13 }
 0x168   :  { %v657_v34 = vsub.f32 %v641_v52, %v649_v10 }
 0x169   :  { %794 = vperm.xlu2 %2345, %v3065_v56   ;;  %v653_v60 = vmul.f32 %v3087_v48, %v3087_v48 }
 0x16a   :  { %v673_v16 = vadd.f32 1e-05, %v657_v34  ;;  %v713_v34 = vmul.f32 0.5, %v712_v49 }
 0x16c   :  { %2351 = vrsqrt.f32 %v673_v16  ;;  %vm696_vm4 = vweird.f32 %v673_v16 }
 0x16d   :  { %v624_v14 = vpop.xlane.xlu1 %623  ;;  %2353 = vrsqrt.f32 %v3067_v13  ;;  %v614_v15 = vpop.xlane.xlu2 %613 }
 0x16e   :  { %v644_v46 = vmul.f32 0.001953125, %v624_v14  ;;  %v642_v9 = vmul.f32 0.001953125, %v614_v15  ;;  %v655_v14 = vmul.f32 %v3084_v35, %v3084_v35 }
 0x170   :  { %v660_v44 = vsub.f32 %v644_v46, %v652_v61  ;;  %v658_v58 = vsub.f32 %v642_v9, %v650_v36 }
 0x172   :  { %v2352_v45 = vpop.eup %2351  ;;  %v676_v50 = vadd.f32 1e-05, %v660_v44  ;;  %v3089_v10 = vadd.f32 1e-05, %v658_v58 }
 0x173   :  { %v691_v0 = vmul.f32 %v2352_v45, %v673_v16  ;;  %v3091_v40 = vpop.eup %2353  ;;  %vm697_vm3 = vweird.f32 %v2352_v45 }
 0x174   :  { %2355 = vrsqrt.f32 %v676_v50  ;;  %v741_v61 = vmul.f32 %v3091_v40, %v3067_v13  ;;  %vm698_vm5 = vmor %vm696_vm4, %vm697_vm3  ;;  %vm726_vm11 = vweird.f32 %v676_v50  ;;  %vm706_vm12 = vweird.f32 %v3089_v10 }
 0x175   :  { %v692_v52 = vmul.f32 %v2352_v45, %v691_v0  ;;  %2357 = vrsqrt.f32 %v3089_v10  ;;  %v639_v8 = vpop.xlane.xlu1 %638  ;;  %v629_v12 = vpop.xlane.xlu2 %628  ;;  %v714_v0 = vsub.f32 1.5, %v713_v34  ;;  %vm747_vm15 = vweird.f32 %v3091_v40 }
 0x176   :  { %v647_v17 = vmul.f32 0.001953125, %v639_v8  ;;  %v645_v15 = vmul.f32 0.001953125, %v629_v12  ;;  %v742_v8 = vmul.f32 %v3091_v40, %v741_v61  ;;  %vm748_vm2 = vmor %vm746_vm0, %vm747_vm15 }
 0x177   :  { %v693_v46 = vmul.f32 0.5, %v692_v52  ;;  %v665_v52 = vld [vmem:[%s4748_s3 + $0x8] sm:$0xff]  ;;  %v715_v61 = vmul.f32 %v3072_v26, %v714_v0 }
 0x178   :  { %v663_v36 = vsub.f32 %v647_v17, %v655_v14  ;;  %v661_v44 = vsub.f32 %v645_v15, %v653_v60 }
 0x179   :  { %v694_v9 = vsub.f32 1.5, %v693_v46  ;;  %v743_v46 = vmul.f32 0.5, %v742_v8  ;;  %v719_v0 = vsel %vm3117_vm8, %v3072_v26, %v715_v61  ;;  %v666_v26 = vld [vmem:[%s4748_s3 + $0x10] sm:$0xff] }
 0x17a   :  { %v2356_v58 = vpop.eup %2355  ;;  %v3100_v49 = vadd.f32 1e-05, %v663_v36  ;;  %v3103_v24 = vadd.f32 1e-05, %v661_v44 }
 0x17b   :  { %v2358_v28 = vpop.eup %2357  ;;  %v721_v1 = vmul.f32 %v2356_v58, %v676_v50  ;;  %v695_v12 = vmul.f32 %v2352_v45, %v694_v9  ;;  %vm727_vm9 = vweird.f32 %v2356_v58 }
 0x17c   :  { %v701_v14 = vmul.f32 %v2358_v28, %v3089_v10  ;;  %2359 = vrsqrt.f32 %v3100_v49  ;;  %vm707_vm10 = vweird.f32 %v2358_v28  ;;  %vm728_vm13 = vmor %vm726_vm11, %vm727_vm9  ;;  %vm756_vm4 = vweird.f32 %v3100_v49 }
 0x17d   :  { %v722_v34 = vmul.f32 %v2356_v58, %v721_v1  ;;  %2361 = vrsqrt.f32 %v3103_v24  ;;  %v699_v16 = vsel %vm698_vm5, %v2352_v45, %v695_v12  ;;  %v667_v12 = vld [vmem:[%s4748_s3 + $0x18] sm:$0xff]  ;;  %vm708_vm14 = vmor %vm706_vm12, %vm707_vm10  ;;  %vm736_vm5 = vweird.f32 %v3103_v24 }
 0x17e   :  { %v702_v17 = vmul.f32 %v2358_v28, %v701_v14  ;;  %v3111_v60 = vmul.f32 %v699_v16, %v665_v52  ;;  %v744_v52 = vsub.f32 1.5, %v743_v46  ;;  %v668_v14 = vld [vmem:[%s4748_s3 + $0x20] sm:$0xff] }
 0x17f   :  { %v723_v15 = vmul.f32 0.5, %v722_v34 }
 0x180   :  { %v703_v36 = vmul.f32 0.5, %v702_v17  ;;  %799 = vperm.xlu0 %2344, %v3111_v60   ;;  %v745_v10 = vmul.f32 %v3091_v40, %v744_v52  ;;  %v671_v52 = vld [vmem:[%s4748_s3 + $0x38] sm:$0xff] }
 0x181   :  { %v724_v9 = vsub.f32 1.5, %v723_v15  ;;  %v763_v15 = vmul.f32 %v719_v0, %v667_v12 }
 0x182   :  { %v2360_v45 = vpop.eup %2359  ;;  %v704_v44 = vsub.f32 1.5, %v703_v36  ;;  %v749_v0 = vsel %vm748_vm2, %v3091_v40, %v745_v10  ;;  %v777_v40 = vmul.f32 %v3111_v60, %v3055_v23 }
 0x183   :  { %v2362_v8 = vpop.eup %2361  ;;  %v751_v42 = vmul.f32 %v2360_v45, %v3100_v49  ;;  %v725_v34 = vmul.f32 %v2356_v58, %v724_v9  ;;  %vm757_vm1 = vweird.f32 %v2360_v45 }
 0x184   :  { %v731_v16 = vmul.f32 %v2362_v8, %v3103_v24  ;;  %v705_v50 = vmul.f32 %v2358_v28, %v704_v44  ;;  %vm737_vm3 = vweird.f32 %v2362_v8  ;;  %vm758_vm6 = vmor %vm756_vm4, %vm757_vm1 }
 0x185   :  { %v752_v17 = vmul.f32 %v2360_v45, %v751_v42  ;;  %v729_v61 = vsel %vm728_vm13, %v2356_v58, %v725_v34  ;;  %vm738_vm7 = vmor %vm736_vm5, %vm737_vm3 }
 0x186   :  { %v732_v46 = vmul.f32 %v2362_v8, %v731_v16  ;;  %v764_v36 = vmul.f32 %v729_v61, %v668_v14  ;;  %v709_v1 = vsel %vm708_vm14, %v2358_v28, %v705_v50  ;;  %v670_v28 = vld [vmem:[%s4748_s3 + $0x30] sm:$0xff]  ;;  %v769_v16 = vld [vmem:[%s4749_s4 + $0x8] sm:$0xff]  ;;  %v772_v61 = vld [vmem:[%s4749_s4 + $0x20] sm:$0xff] }
 0x187   :  { %v753_v57 = vmul.f32 0.5, %v752_v17  ;;  %v762_v9 = vmul.f32 %v709_v1, %v666_v26  ;;  %v766_v49 = vmul.f32 %v749_v0, %v670_v28  ;;  %v768_v26 = vld [vmem:[%s4749_s4] sm:$0xff]  ;;  %v785_v50 = vsub.f32 %v769_v16, %v777_v40 }
 0x188   :  { %v733_v18 = vmul.f32 0.5, %v732_v46  ;;  %809 = vperm.xlu0 %2344, %v763_v15   ;;  %814 = vperm.xlu2 %2345, %v764_v36   ;;  %v771_v46 = vld [vmem:[%s4749_s4 + $0x18] sm:$0xff] }
 0x189   :  { %v754_v44 = vsub.f32 1.5, %v753_v57  ;;  %804 = vperm.xlu1 %2346, %v762_v9   ;;  %v778_v24 = vmul.f32 %v762_v9, %v3074_v11  ;;  %v780_v11 = vmul.f32 %v764_v36, %v3069_v47 }
 0x18a   :  { %v734_v58 = vsub.f32 1.5, %v733_v18  ;;  %v669_v18 = vld [vmem:[%s4748_s3 + $0x28] sm:$0xff] }
 0x18b   :  { %v755_v42 = vmul.f32 %v2360_v45, %v754_v44  ;;  %v788_v1 = vsub.f32 %v772_v61, %v780_v11 }
 0x18c   :  { %v735_v57 = vmul.f32 %v2362_v8, %v734_v58 }
 0x18d   :  { %v759_v13 = vsel %vm758_vm6, %v2360_v45, %v755_v42  ;;  %v770_v45 = vld [vmem:[%s4749_s4 + $0x10] sm:$0xff] }
 0x18e   :  { %v767_v12 = vmul.f32 %v759_v13, %v671_v52  ;;  %v739_v14 = vsel %vm738_vm7, %v2362_v8, %v735_v57  ;;  %v776_v8 = vmul.f32 %v3065_v56, %v3043_v21  ;;  %v786_v17 = vsub.f32 %v770_v45, %v778_v24  ;;  %v773_v56 = vld [vmem:[%s4749_s4 + $0x28] sm:$0xff] }
 0x18f   :  { %v765_v34 = vmul.f32 %v739_v14, %v669_v18  ;;  %v779_v21 = vmul.f32 %v763_v15, %v3047_v5  ;;  %v775_v5 = vld [vmem:[%s4749_s4 + $0x38] sm:$0xff]  ;;  %v774_v15 = vld [vmem:[%s4749_s4 + $0x30] sm:$0xff]  ;;  %s2367_s4 = smov 1  }
 0x190   :  { %824 = vperm.xlu0 %2344, %v766_v49   ;;  %829 = vperm.xlu2 %2345, %v767_v12   ;;  %v784_v23 = vsub.f32 %v768_v26, %v776_v8  ;;  %v783_v47 = vmul.f32 %v767_v12, %v3084_v35 }
 0x191   :  { %819 = vperm.xlu1 %2346, %v765_v34   ;;  %v781_v60 = vmul.f32 %v765_v34, %v3087_v48  ;;  %v787_v10 = vsub.f32 %v771_v46, %v779_v21  ;;  %v782_v48 = vmul.f32 %v766_v49, %v3051_v37 }
 0x192   :  { %v791_v36 = vsub.f32 %v775_v5, %v783_v47 }
 0x193   :  { %v789_v9 = vsub.f32 %v773_v56, %v781_v60  ;;  %v790_v44 = vsub.f32 %v774_v15, %v782_v48 }
 0x198   :  { %871 = vperm.xlu0 %2344, %v785_v50   ;;  %876 = vperm.xlu2 %2345, %v786_v17  }
 0x199   :  { %866 = vperm.xlu1 %2346, %v784_v23  }
 0x1a0   :  { %886 = vperm.xlu0 %2344, %v788_v1   ;;  %891 = vperm.xlu2 %2345, %v789_v9  }
 0x1a1   :  { %881 = vperm.xlu1 %2346, %v787_v10  }
 0x1a8   :  { %901 = vperm.xlu0 %2344, %v791_v36  }
 0x1a9   :  { %896 = vperm.xlu1 %2346, %v790_v44  }
 0x1c3   :  { %v3186_v58 = vpop.permute.xlu2 %794 }
 0x1c4   :  { %v832_v45 = vmul.f32 %v3186_v58, %v2760_v38  ;;  %v835_v8 = vmul.f32 %v3186_v58, %v2795_v22 }
 0x1e2   :  { %v3188_v28 = vpop.permute.xlu2 %814 }
 0x1e3   :  { %v851_v56 = vmul.f32 %v3188_v28, %v2982_v4 }
 0x1ea   :  { %v3190_v0 = vpop.permute.xlu2 %829 }
 0x1f2   :  { %v3192_v35 = vpop.permute.xlu0 %799  ;;  %v3196_v42 = vpop.permute.xlu2 %876 }
 0x1f3   :  { %v839_v16 = vmul.f32 %v3192_v35, %v2823_v29  ;;  %v836_v22 = vmul.f32 %v3192_v35, %v2797_v25 }
 0x1fa   :  { %v3194_v52 = vpop.permute.xlu0 %809  ;;  %v3213_v40 = vpop.permute.xlu2 %891 }
 0x1fb   :  { %v3198_v37 = vpop.permute.xlu1 %804  ;;  %v847_v46 = vmul.f32 %v3194_v52, %v2841_v55 }
 0x1fc   :  { %v843_v18 = vmul.f32 %v3198_v37, %v2934_v31  ;;  %v840_v55 = vmul.f32 %v3198_v37, %v2913_v43 }
 0x1fe   :  { %v915_v57 = vadd.f32 %v3196_v42, %v843_v18  ;;  %v863_v18 = vmul.f32 %v3190_v0, %v3011_v54 }
 0x200   :  { %vm947_vm8 = vcmp.ge.f32.partialorder %v915_v57, 0.0  ;;  %v979_v13 = vmul.f32 0.0001, %v915_v57 }
 0x202   :  { %v3203_v49 = vpop.permute.xlu0 %824  ;;  %v3205_v12 = vsel %vm947_vm8, %v915_v57, %v979_v13  ;;  %v912_v57 = vadd.f32 %v3196_v42, %v840_v55 }
 0x203   :  { %4885 = vst [vmem:[#allocation20_spill] sm:$0xff] %v3205_v12  ;;  %v3207_v14 = vpop.permute.xlu1 %819  ;;  %1495 = vrot.lane.b32.xlu0 %v3205_v12, %s2367_s4  ;;  %v859_v43 = vmul.f32 %v3203_v49, %v2963_v33  ;;  %v833_v33 = vmul.f32 %v3186_v58, %v2762_v39 }
 0x204   :  { %v855_v34 = vmul.f32 %v3207_v14, %v2860_v41  ;;  %vm944_vm2 = vcmp.ge.f32.partialorder %v912_v57, 0.0 }
 0x206   :  { %v927_v31 = vadd.f32 %v3213_v40, %v855_v34 }
 0x208   :  { %vm959_vm9 = vcmp.ge.f32.partialorder %v927_v31, 0.0  ;;  %v991_v24 = vmul.f32 0.0001, %v927_v31 }
 0x20a   :  { %v3222_v26 = vpop.permute.xlu0 %871  ;;  %v3224_v50 = vsel %vm959_vm9, %v927_v31, %v991_v24 }
 0x20b   :  { %4886 = vst [vmem:[#allocation5_spill] sm:$0xff] %v3224_v50  ;;  %v911_v41 = vadd.f32 %v3222_v26, %v839_v16  ;;  %v867_v17 = vpop.permute.xlu1 %866  ;;  %1501 = vrot.lane.b32.xlu0 %v3224_v50, %s2367_s4  ;;  %v908_v1 = vadd.f32 %v3222_v26, %v836_v22  ;;  %v834_v16 = vmul.f32 %v3186_v58, %v2774_v2 }
 0x20c   :  { %v904_v23 = vadd.f32 %v867_v17, %v832_v45  ;;  %v907_v11 = vadd.f32 %v867_v17, %v835_v8 }
 0x20d   :  { %vm943_vm10 = vcmp.ge.f32.partialorder %v911_v41, 0.0  ;;  %v975_v29 = vmul.f32 0.0001, %v911_v41  ;;  %v972_v15 = vmul.f32 0.0001, %v908_v1  ;;  %vm940_vm15 = vcmp.ge.f32.partialorder %v908_v1, 0.0 }
 0x20e   :  { %vm939_vm11 = vcmp.ge.f32.partialorder %v907_v11, 0.0  ;;  %v971_v60 = vmul.f32 0.0001, %v907_v11  ;;  %v968_v38 = vmul.f32 0.0001, %v904_v23  ;;  %vm936_vm12 = vcmp.ge.f32.partialorder %v904_v23, 0.0 }
 0x20f   :  { %v3229_v61 = vsel %vm943_vm10, %v911_v41, %v975_v29  ;;  %v3271_v34 = vsel %vm940_vm15, %v908_v1, %v972_v15  ;;  %v976_v41 = vmul.f32 0.0001, %v912_v57  ;;  %v844_v29 = vmul.f32 %v3194_v52, %v2804_v27 }
 0x210   :  { %4887 = vst [vmem:[#allocation6_spill] sm:$0xff] %v3229_v61  ;;  %1493 = vrot.lane.b32.xlu1 %v3229_v61, %s2367_s4  ;;  %v3235_v21 = vsel %vm939_vm11, %v907_v11, %v971_v60  ;;  %v3246_v10 = vsel %vm936_vm12, %v904_v23, %v968_v38  ;;  %v906_v23 = vadd.f32 %v867_v17, %v834_v16 }
 0x211   :  { %1491 = vrot.lane.b32.xlu2 %v3235_v21, %s2367_s4  ;;  %v905_v60 = vadd.f32 %v867_v17, %v833_v33  ;;  %v3294_v2 = vsel %vm944_vm2, %v912_v57, %v976_v41  ;;  %v838_v27 = vmul.f32 %v3192_v35, %v2808_v30  ;;  %v837_v17 = vmul.f32 %v3192_v35, %v2799_v53 }
 0x212   :  { %v3244_v9 = vpop.permute.xlu0 %886  ;;  %v970_v58 = vmul.f32 0.0001, %v906_v23  ;;  %vm938_vm3 = vcmp.ge.f32.partialorder %v906_v23, 0.0  ;;  %v842_v35 = vmul.f32 %v3198_v37, %v2925_v62  ;;  %v856_v41 = vmul.f32 %v3203_v49, %v2909_v59 }
 0x213   :  { %v923_v25 = vadd.f32 %v3244_v9, %v851_v56  ;;  %v3249_v47 = vpop.permute.xlu1 %881  ;;  %1515 = vrot.lane.b32.xlu0 %v3246_v10, %s2367_s4  ;;  %v969_v22 = vmul.f32 0.0001, %v905_v60  ;;  %vm937_vm4 = vcmp.ge.f32.partialorder %v905_v60, 0.0 }
 0x214   :  { %v919_v4 = vadd.f32 %v3249_v47, %v847_v46  ;;  %v916_v39 = vadd.f32 %v3249_v47, %v844_v29  ;;  %v910_v46 = vadd.f32 %v3222_v26, %v838_v27  ;;  %v3303_v1 = vsel %vm938_vm3, %v906_v23, %v970_v58 }
 0x215   :  { %vm955_vm13 = vcmp.ge.f32.partialorder %v923_v25, 0.0  ;;  %v987_v5 = vmul.f32 0.0001, %v923_v25 }
 0x216   :  { %vm951_vm14 = vcmp.ge.f32.partialorder %v919_v4, 0.0  ;;  %v983_v48 = vmul.f32 0.0001, %v919_v4  ;;  %v980_v56 = vmul.f32 0.0001, %v916_v39  ;;  %vm948_vm5 = vcmp.ge.f32.partialorder %v916_v39, 0.0 }
 0x217   :  { %v3256_v36 = vsel %vm955_vm13, %v923_v25, %v987_v5  ;;  %v848_v25 = vmul.f32 %v3188_v28, %v2958_v19  ;;  %v3308_v5 = vsel %vm937_vm4, %v905_v60, %v969_v22  ;;  %v974_v19 = vmul.f32 0.0001, %v910_v46 }
 0x218   :  { %4888 = vst [vmem:[#allocation21_spill] sm:$0xff] %v3256_v36  ;;  %v3258_v44 = vsel %vm951_vm14, %v919_v4, %v983_v48  ;;  %1499 = vrot.lane.b32.xlu1 %v3256_v36, %s2367_s4  ;;  %v909_v4 = vadd.f32 %v3222_v26, %v837_v17  ;;  %v3315_v30 = vsel %vm948_vm5, %v916_v39, %v980_v56  ;;  %vm942_vm6 = vcmp.ge.f32.partialorder %v910_v46, 0.0 }
 0x219   :  { %4889 = vst [vmem:[#allocation15_spill] sm:$0xff] %v3258_v44  ;;  %1497 = vrot.lane.b32.xlu2 %v3258_v44, %s2367_s4  ;;  %v920_v53 = vadd.f32 %v3244_v9, %v848_v25  ;;  %v841_v26 = vmul.f32 %v3198_v37, %v2915_v6  ;;  %v852_v48 = vmul.f32 %v3207_v14, %v2843_v32 }
 0x21a   :  { %v3269_v13 = vpop.permute.xlu0 %901  ;;  %v973_v55 = vmul.f32 0.0001, %v909_v4  ;;  %vm941_vm7 = vcmp.ge.f32.partialorder %v909_v4, 0.0  ;;  %v3326_v57 = vsel %vm942_vm6, %v910_v46, %v974_v19  ;;  %v849_v39 = vmul.f32 %v3188_v28, %v2960_v20 }
 0x21b   :  { %v935_v31 = vadd.f32 %v3269_v13, %v863_v18  ;;  %v3274_v24 = vpop.permute.xlu1 %896  ;;  %1521 = vrot.lane.b32.xlu0 %v3271_v34, %s2367_s4  ;;  %v984_v15 = vmul.f32 0.0001, %v920_v53  ;;  %v914_v18 = vadd.f32 %v3196_v42, %v842_v35  ;;  %4892 = vst [vmem:[#allocation8_spill] sm:$0xff] %v3326_v57  ;;  %vm952_vm8 = vcmp.ge.f32.partialorder %v920_v53, 0.0 }
 0x21c   :  { %v931_v54 = vadd.f32 %v3274_v24, %v859_v43  ;;  %v913_v62 = vadd.f32 %v3196_v42, %v841_v26  ;;  %v3329_v43 = vsel %vm941_vm7, %v909_v4, %v973_v55  ;;  %v924_v6 = vadd.f32 %v3213_v40, %v852_v48 }
 0x21d   :  { %vm967_vm0 = vcmp.ge.f32.partialorder %v935_v31, 0.0  ;;  %v999_v45 = vmul.f32 0.0001, %v935_v31  ;;  %v3336_v37 = vsel %vm952_vm8, %v920_v53, %v984_v15  ;;  %v978_v32 = vmul.f32 0.0001, %v914_v18  ;;  %v4898_v15 = vld [vmem:[#allocation24_spill] sm:$0xff] }
 0x21e   :  { %vm963_vm1 = vcmp.ge.f32.partialorder %v931_v54, 0.0  ;;  %v995_v8 = vmul.f32 0.0001, %v931_v54  ;;  %4893 = vst [vmem:[#allocation9_spill] sm:$0xff] %v3336_v37  ;;  %vm946_vm9 = vcmp.ge.f32.partialorder %v914_v18, 0.0  ;;  %v846_v42 = vmul.f32 %v3194_v52, %v2825_v51 }
 0x21f   :  { %v3283_v11 = vsel %vm967_vm0, %v935_v31, %v999_v45  ;;  %v977_v31 = vmul.f32 0.0001, %v913_v62  ;;  %vm945_vm10 = vcmp.ge.f32.partialorder %v913_v62, 0.0  ;;  %v988_v45 = vmul.f32 0.0001, %v924_v6 }
 0x220   :  { %4890 = vst [vmem:[#allocation23_spill] sm:$0xff] %v3283_v11  ;;  %v3287_v38 = vsel %vm963_vm1, %v931_v54, %v995_v8  ;;  %1505 = vrot.lane.b32.xlu1 %v3283_v11, %s2367_s4  ;;  %v4894_v54 = vld [vmem:[#allocation26_spill] sm:$0xff]  ;;  %v918_v33 = vadd.f32 %v3249_v47, %v846_v42  ;;  %v3345_v8 = vsel %vm946_vm9, %v914_v18, %v978_v32  ;;  %vm956_vm11 = vcmp.ge.f32.partialorder %v924_v6, 0.0 }
 0x221   :  { %4891 = vst [vmem:[#allocation7_spill] sm:$0xff] %v3287_v38  ;;  %1503 = vrot.lane.b32.xlu2 %v3287_v38, %s2367_s4  ;;  %v845_v16 = vmul.f32 %v3194_v52, %v4894_v54  ;;  %v3352_v29 = vsel %vm945_vm10, %v913_v62, %v977_v31  ;;  %v928_v51 = vadd.f32 %v3274_v24, %v856_v41  ;;  %vm1398_vm8 = vcmask 1040384  }
 0x222   :  { %4895 = vst [vmem:[#allocation10_spill] sm:$0xff] %v3345_v8  ;;  %v3357_v52 = vsel %vm956_vm11, %v924_v6, %v988_v45  ;;  %v982_v60 = vmul.f32 0.0001, %v918_v33  ;;  %vm950_vm12 = vcmp.ge.f32.partialorder %v918_v33, 0.0  ;;  %v860_v17 = vmul.f32 %v3190_v0, %v2995_v63  ;;  %v4900_v45 = vld [vmem:[#allocation4_spill] sm:$0xff] }
 0x223   :  { %1527 = vrot.lane.b32.xlu0 %v3294_v2, %s2367_s4  ;;  %v917_v23 = vadd.f32 %v3249_v47, %v845_v16  ;;  %v850_v47 = vmul.f32 %v3188_v28, %v2972_v7  ;;  %v992_v58 = vmul.f32 0.0001, %v928_v51  ;;  %vm960_vm14 = vcmp.ge.f32.partialorder %v928_v51, 0.0 }
 0x224   :  { %v3366_v27 = vsel %vm950_vm12, %v918_v33, %v982_v60  ;;  %v921_v56 = vadd.f32 %v3244_v9, %v849_v39  ;;  %v932_v20 = vadd.f32 %v3269_v13, %v860_v17  ;;  %v854_v28 = vmul.f32 %v3207_v14, %v2849_v3  ;;  %v4901_v33 = vld [vmem:[#allocation3_spill] sm:$0xff] }
 0x225   :  { %v981_v59 = vmul.f32 0.0001, %v917_v23  ;;  %vm949_vm13 = vcmp.ge.f32.partialorder %v917_v23, 0.0  ;;  %v922_v22 = vadd.f32 %v3244_v9, %v850_v47  ;;  %4896 = vst [vmem:[#allocation11_spill] sm:$0xff] %v3366_v27  ;;  %v3378_v7 = vsel %vm960_vm14, %v928_v51, %v992_v58  ;;  %v4897_v9 = vld [vmem:[#allocation22_spill] sm:$0xff] }
 0x226   :  { %v853_v25 = vmul.f32 %v3207_v14, %v4897_v9  ;;  %v985_v4 = vmul.f32 0.0001, %v921_v56  ;;  %vm953_vm0 = vcmp.ge.f32.partialorder %v921_v56, 0.0  ;;  %v996_v53 = vmul.f32 0.0001, %v932_v20 }
 0x227   :  { %v3373_v46 = vsel %vm949_vm13, %v917_v23, %v981_v59  ;;  %v986_v63 = vmul.f32 0.0001, %v922_v22  ;;  %vm954_vm15 = vcmp.ge.f32.partialorder %v922_v22, 0.0  ;;  %v926_v35 = vadd.f32 %v3213_v40, %v854_v28 }
 0x228   :  { %1519 = vrot.lane.b32.xlu1 %v3303_v1, %s2367_s4  ;;  %vm964_vm1 = vcmp.ge.f32.partialorder %v932_v20, 0.0  ;;  %v925_v26 = vadd.f32 %v3213_v40, %v853_v25  ;;  %v3392_v3 = vsel %vm953_vm0, %v921_v56, %v985_v4  ;;  %v858_v18 = vmul.f32 %v3203_v49, %v4898_v15  ;;  %v4899_v40 = vld [vmem:[#allocation2_spill] sm:$0xff] }
 0x229   :  { %1517 = vrot.lane.b32.xlu2 %v3308_v5, %s2367_s4  ;;  %v3387_v19 = vsel %vm954_vm15, %v922_v22, %v986_v63  ;;  %v3396_v14 = vsel %vm964_vm1, %v932_v20, %v996_v53  ;;  %v990_v55 = vmul.f32 0.0001, %v926_v35  ;;  %vm958_vm2 = vcmp.ge.f32.partialorder %v926_v35, 0.0 }
 0x22a   :  { %v989_v48 = vmul.f32 0.0001, %v925_v26  ;;  %vm957_vm3 = vcmp.ge.f32.partialorder %v925_v26, 0.0  ;;  %v857_v62 = vmul.f32 %v3203_v49, %v4899_v40  ;;  %v930_v6 = vadd.f32 %v3274_v24, %v858_v18 }
 0x22b   :  { %1533 = vrot.lane.b32.xlu0 %v3315_v30, %s2367_s4  ;;  %v3405_v32 = vsel %vm958_vm2, %v926_v35, %v990_v55  ;;  %v862_v49 = vmul.f32 %v3190_v0, %v4900_v45  ;;  %v861_v41 = vmul.f32 %v3190_v0, %v4901_v33  ;;  %v1417_v20 = vrot.slane %v3205_v12, 7 }
 0x22c   :  { %v929_v31 = vadd.f32 %v3274_v24, %v857_v62  ;;  %v3410_v42 = vsel %vm957_vm3, %v925_v26, %v989_v48  ;;  %v994_v54 = vmul.f32 0.0001, %v930_v6  ;;  %vm962_vm4 = vcmp.ge.f32.partialorder %v930_v6, 0.0 }
 0x22d   :  { %v934_v24 = vadd.f32 %v3269_v13, %v862_v49  ;;  %v933_v51 = vadd.f32 %v3269_v13, %v861_v41  ;;  %v1441_v63 = vrot.slane %v3224_v50, 7  ;;  %v1409_v9 = vrot.slane %v3229_v61, 7 }
 0x22e   :  { %v993_v16 = vmul.f32 0.0001, %v929_v31  ;;  %vm961_vm5 = vcmp.ge.f32.partialorder %v929_v31, 0.0  ;;  %v3419_v23 = vsel %vm962_vm4, %v930_v6, %v994_v54  ;;  %v1402_v35 = vrot.slane %v3235_v21, 7 }
 0x22f   :  { %v998_v59 = vmul.f32 0.0001, %v934_v24  ;;  %vm966_vm6 = vcmp.ge.f32.partialorder %v934_v24, 0.0  ;;  %v997_v47 = vmul.f32 0.0001, %v933_v51  ;;  %vm965_vm7 = vcmp.ge.f32.partialorder %v933_v51, 0.0 }
 0x230   :  { %1525 = vrot.lane.b32.xlu1 %v3326_v57, %s2367_s4  ;;  %v3424_v60 = vsel %vm961_vm5, %v929_v31, %v993_v16  ;;  %v1399_v26 = vrot.slane %v3246_v10, 7  ;;  %v1403_v55 = vrot.slane %v3271_v34, 7  ;;  %v1032_v15 = vlaneseq }
 0x231   :  { %1523 = vrot.lane.b32.xlu2 %v3329_v43, %s2367_s4  ;;  %v3428_v39 = vsel %vm966_vm6, %v934_v24, %v998_v59  ;;  %v3432_v0 = vsel %vm965_vm7, %v933_v51, %v997_v47  ;;  %v1433_v18 = vrot.slane %v3256_v36, 7  ;;  %v1400_v40 = vrot.slane %v3308_v5, 7 }
 0x232   :  { %v1401_v62 = vrot.slane %v3303_v1, 7  ;;  %v1425_v31 = vrot.slane %v3258_v44, 7  ;;  %v1365_v54 = vrot.slane %v3283_v11, 7  ;;  %v1449_v33 = vrot.slane %v3287_v38, 7 }
 0x233   :  { %1539 = vrot.lane.b32.xlu0 %v3336_v37, %s2367_s4  ;;  %v1407_v41 = vrot.slane %v3326_v57, 7  ;;  %v3473_v4 = vand.u32 127, %v1032_v15  ;;  %vm1563_vm9 = vcmask 7168   ;;  %v3490_v45 = vsel %vm1398_vm8, %v1402_v35, %v1409_v9 }
 0x234   :  { %v3482_v59 = vsel %vm1398_vm8, %v1365_v54, %v1402_v35  ;;  %4905 = vst [vmem:[#allocation25_spill] sm:$0xff] %v3490_v45  ;;  %v3495_v28 = vsel %vm1398_vm8, %v1409_v9, %v1417_v20  ;;  %v3498_v24 = vsel %vm1398_vm8, %v1417_v20, %v1425_v31  ;;  %v3501_v16 = vsel %vm1398_vm8, %v1425_v31, %v1433_v18 }
 0x235   :  { %4904 = vst [vmem:[#allocation14_spill] sm:$0xff] %v3473_v4  ;;  %v1043_v47 = vadd.s32 128, %v3473_v4  ;;  %v3508_v51 = vshrl.u32 %v1032_v15, 7  ;;  %v3511_v35 = vsel %vm1398_vm8, %v1433_v18, %v1441_v63  ;;  %v3514_v9 = vsel %vm1398_vm8, %v1449_v33, %v1365_v54 }
 0x236   :  { %4906 = vst [vmem:[#allocation16_spill] sm:$0xff] %v3495_v28  ;;  %v1154_v20 = vand.u32 15, %v3473_v4  ;;  %v3518_v31 = vsel %vm1398_vm8, %v1441_v63, %v1449_v33  ;;  %v4914_v50 = vrot.slane %v3396_v14, 7  ;;  %v1404_v36 = vsel %vm1398_vm8, %v1399_v26, %v1403_v55 }
 0x237   :  { %4907 = vst [vmem:[#allocation17_spill] sm:$0xff] %v3498_v24  ;;  %vm1612_vm10 = vcmask 1044480   ;;  %v4918_v44 = vrot.slane %v3294_v2, 7  ;;  %v4940_v45 = vrot.slane %v3345_v8, 7  ;;  %v4945_v57 = vrot.slane %v3336_v37, 7 }
 0x238   :  { %1531 = vrot.lane.b32.xlu1 %v3345_v8, %s2367_s4  ;;  %4908 = vst [vmem:[#allocation18_spill] sm:$0xff] %v3501_v16  ;;  %v1487_v16 = vsel %vm1398_vm8, %v4914_v50, %v1399_v26  ;;  %v1050_v50 = vand.u32 3, %v3508_v51  ;;  %v4916_v26 = vrot.slane %v3428_v39, 7  ;;  %vm3548_vm11 = vcmp.ne.s32.totalorder %v1154_v20, 0 }
 0x239   :  { %1529 = vrot.lane.b32.xlu2 %v3352_v29, %s2367_s4  ;;  %4910 = vst [vmem:[#allocation26_spill] sm:$0xff] %v3508_v51  ;;  %v4924_v20 = vrot.slane %v3315_v30, 7  ;;  %v4947_v61 = vrot.slane %v3387_v19, 7  ;;  %vm1849_vm0 = vcmask 1043456  }
 0x23a   :  { %4911 = vst [vmem:[#allocation22_spill] sm:$0xff] %v3511_v35  ;;  %v3537_v35 = vsel %vm1398_vm8, %v4916_v26, %v1401_v62  ;;  %v1034_v26 = vadd.s32 8, %v3508_v51  ;;  %vm3605_vm13 = vcmp.ne.s32.totalorder %v1050_v50, 0  ;;  %v4944_v50 = vrot.slane %v3357_v52, 7 }
 0x23b   :  { %1545 = vrot.lane.b32.xlu0 %v3357_v52, %s2367_s4  ;;  %4912 = vst [vmem:[#allocation24_spill] sm:$0xff] %v3514_v9  ;;  %v1161_v9 = vand.u32 15, %v1043_v47 }
 0x23c   :  { %4913 = vst [vmem:[#allocation2_spill] sm:$0xff] %v3518_v31 }
 0x23d   :  { %vm3581_vm12 = vcmp.ne.s32.totalorder %v1161_v9, 0  ;;  %v3603_v9 = vadd.s32 256, %v3473_v4 }
 0x23f   :  { %4936 = vst [vmem:[#allocation30_spill] sm:$0xff] %v3603_v9 }
 0x240   :  { %1537 = vrot.lane.b32.xlu1 %v3366_v27, %s2367_s4 }
 0x241   :  { %1535 = vrot.lane.b32.xlu2 %v3373_v46, %s2367_s4 }
 0x243   :  { %1551 = vrot.lane.b32.xlu0 %v3378_v7, %s2367_s4 }
 0x248   :  { %1543 = vrot.lane.b32.xlu1 %v3387_v19, %s2367_s4 }
 0x249   :  { %1541 = vrot.lane.b32.xlu2 %v3392_v3, %s2367_s4 }
 0x24b   :  { %1557 = vrot.lane.b32.xlu0 %v3396_v14, %s2367_s4 }
 0x250   :  { %1549 = vrot.lane.b32.xlu1 %v3405_v32, %s2367_s4 }
 0x251   :  { %1547 = vrot.lane.b32.xlu2 %v3410_v42, %s2367_s4 }
 0x258   :  { %1555 = vrot.lane.b32.xlu1 %v3419_v23, %s2367_s4 }
 0x259   :  { %1553 = vrot.lane.b32.xlu2 %v3424_v60, %s2367_s4 }
 0x260   :  { %1561 = vrot.lane.b32.xlu1 %v3428_v39, %s2367_s4 }
 0x261   :  { %1559 = vrot.lane.b32.xlu2 %v3432_v0, %s2367_s4 }
 0x26b   :  { %v3436_v13 = vpop.permute.xlu2 %1491 }
 0x273   :  { %v3438_v58 = vpop.permute.xlu2 %1497 }
 0x275   :  { %v3440_v22 = vpop.permute.xlu0 %1495 }
 0x27b   :  { %v3442_v17 = vpop.permute.xlu2 %1503 }
 0x27c   :  { %4902 = vst [vmem:[#allocation12_spill] sm:$0xff] %v3442_v17 }
 0x27d   :  { %v3444_v56 = vpop.permute.xlu0 %1501 }
 0x27e   :  { %4903 = vst [vmem:[#allocation13_spill] sm:$0xff] %v3444_v56 }
 0x282   :  { %v3452_v53 = vpop.permute.xlu1 %1493 }
 0x283   :  { %v3457_v48 = vpop.permute.xlu2 %1517 }
 0x285   :  { %v1516_v49 = vpop.permute.xlu0 %1515 }
 0x286   :  { %v3506_v25 = vsel %vm1563_vm9, %v3436_v13, %v1516_v49  ;;  %v3526_v15 = vsel %vm1563_vm9, %v1516_v49, %v3457_v48  ;;  %v4917_v49 = vrot.slane %v3432_v0, 7 }
 0x287   :  { %4909 = vst [vmem:[#allocation19_spill] sm:$0xff] %v3506_v25  ;;  %v4778_v63 = vrot.slane %v3506_v25, 3 }
 0x288   :  { %4915 = vst [vmem:[#allocation4_spill] sm:$0xff] %v3526_v15  ;;  %v1488_v24 = vsel %vm1398_vm8, %v4917_v49, %v1400_v40  ;;  %v3559_v49 = vsel %vm1398_vm8, %v1401_v62, %v1407_v41 }
 0x289   :  { %4922 = vst [vmem:[#allocation27_spill] sm:$0xff] %v3559_v49  ;;  %v4939_v49 = vrot.slane %v3366_v27, 7 }
 0x28a   :  { %v3487_v38 = vpop.permute.xlu1 %1499 }
 0x28b   :  { %v3492_v6 = vpop.permute.xlu2 %1523 }
 0x28d   :  { %v1522_v11 = vpop.permute.xlu0 %1521 }
 0x28e   :  { %v1567_v18 = vsel %vm1563_vm9, %v1522_v11, %v3492_v6  ;;  %v1597_v54 = vsel %vm1563_vm9, %v3452_v53, %v1522_v11  ;;  %v3545_v11 = vsel %vm1398_vm8, %v1403_v55, %v4918_v44  ;;  %v4923_v44 = vrot.slane %v3329_v43, 7 }
 0x28f   :  { %v1614_v33 = vrot.slane %v1597_v54, 3  ;;  %v1617_v31 = vrot.slane %v1567_v18, 3  ;;  %v4925_v54 = vrot.slane %v3294_v2, 7 }
 0x290   :  { %v1406_v55 = vsel %vm1398_vm8, %v1400_v40, %v4923_v44  ;;  %v4931_v44 = vrot.slane %v3352_v29, 7 }
 0x291   :  { %v1615_v18 = vsel %vm1612_vm10, %v4778_v63, %v1614_v33  ;;  %v3569_v12 = vsel %vm1398_vm8, %v4925_v54, %v4924_v20  ;;  %v4926_v63 = vrot.slane %v3345_v8, 7  ;;  %v4932_v54 = vrot.slane %v3329_v43, 7 }
 0x292   :  { %v3556_v28 = vpop.permute.xlu1 %1505  ;;  %v4948_v8 = vmov %v4939_v49 }
 0x293   :  { %4921 = vst [vmem:[#allocation3_spill] sm:$0xff] %v3556_v28  ;;  %v3574_v25 = vsel %vm1398_vm8, %v1407_v41, %v4926_v63  ;;  %v4928_v28 = vrot.slane %v3526_v15, 3  ;;  %v3579_v17 = vpop.permute.xlu2 %1529  ;;  %v3590_v20 = vsel %vm1398_vm8, %v4932_v54, %v4931_v44  ;;  %v4933_v41 = vrot.slane %v3336_v37, 7 }
 0x294   :  { %4927 = vst [vmem:[#allocation28_spill] sm:$0xff] %v3574_v25  ;;  %v4934_v63 = vrot.slane %v3315_v30, 7  ;;  %v1057_v44 = vand.u32 3, %v1034_v26  ;;  %v3628_v26 = vsel %vm1398_vm8, %v4945_v57, %v4944_v50  ;;  %v4950_v57 = vrot.slane %v3392_v3, 7 }
 0x295   :  { %v1618_v62 = vsel %vm1612_vm10, %v4928_v28, %v1617_v31  ;;  %v1713_v28 = vsel %vm3548_vm11, %v1615_v18, %v3246_v10  ;;  %v1528_v54 = vpop.permute.xlu0 %1527  ;;  %v4943_v18 = vrot.slane %v3352_v29, 7  ;;  %4946 = vst [vmem:[#allocation32_spill] sm:$0xff] %v3628_v26  ;;  %v4951_v50 = vrot.slane %v3373_v46, 7 }
 0x296   :  { %v3597_v15 = vsel %vm1398_vm8, %v4934_v63, %v4933_v41  ;;  %v3614_v41 = vsel %vm1398_vm8, %v4940_v45, %v4939_v49  ;;  %v4942_v63 = vrot.slane %v3373_v46, 7  ;;  %v3635_v45 = vsel %vm1398_vm8, %v4948_v8, %v4947_v61 }
 0x297   :  { %4935 = vst [vmem:[#allocation29_spill] sm:$0xff] %v3597_v15  ;;  %v1570_v49 = vsel %vm1563_vm9, %v1528_v54, %v3579_v17  ;;  %v3649_v26 = vsel %vm1398_vm8, %v4951_v50, %v4950_v57  ;;  %v1745_v8 = vsel %vm3605_vm13, %v1487_v16, %v1713_v28  ;;  %v1045_v37 = vadd.s32 384, %v3473_v4 }
 0x298   :  { %4941 = vst [vmem:[#allocation31_spill] sm:$0xff] %v3614_v41  ;;  %v3621_v15 = vsel %vm1398_vm8, %v4943_v18, %v4942_v63  ;;  %v1598_v63 = vsel %vm1563_vm9, %v3440_v22, %v1528_v54  ;;  %v1714_v18 = vsel %vm3581_vm12, %v1618_v62, %v3308_v5  ;;  %v1627_v61 = vrot.slane %v1570_v49, 3 }
 0x299   :  { %4949 = vst [vmem:[#allocation33_spill] sm:$0xff] %v3635_v45  ;;  %v1625_v41 = vrot.slane %v1598_v63, 3  ;;  %v4952_v45 = vrot.slane %v3378_v7, 7  ;;  %v4953_v54 = vrot.slane %v3357_v52, 7  ;;  %v1168_v62 = vand.u32 15, %v3603_v9 }
 0x29a   :  { %vm3662_vm14 = vcmp.ne.s32.totalorder %v1057_v44, 0  ;;  %v4956_v49 = vrot.slane %v3405_v32, 7  ;;  %v4957_v63 = vrot.slane %v3387_v19, 7  ;;  %v3676_v57 = vadd.s32 16, %v3508_v51  ;;  %v1520_v50 = vpop.permute.xlu1 %1519 }
 0x29b   :  { %v3658_v27 = vsel %vm1398_vm8, %v4953_v54, %v4952_v45  ;;  %v1626_v28 = vsel %vm1612_vm10, %v1614_v33, %v1625_v41  ;;  %v1628_v45 = vsel %vm1612_vm10, %v1617_v31, %v1627_v61  ;;  %v1746_v44 = vsel %vm3605_vm13, %v1488_v24, %v1714_v18  ;;  %v3696_v24 = vpop.permute.xlu2 %1535 }
 0x29c   :  { %v3671_v16 = vsel %vm1398_vm8, %v4957_v63, %v4956_v49  ;;  %4959 = vst [vmem:[#allocation35_spill] sm:$0xff] %v3676_v57  ;;  %v3681_v54 = vadd.f32 %v1745_v8, %v3246_v10  ;;  %v1717_v9 = vsel %vm3548_vm11, %v1626_v28, %v3271_v34  ;;  %v1718_v33 = vsel %vm3581_vm12, %v1628_v45, %v3329_v43 }
 0x29d   :  { %4958 = vst [vmem:[#allocation34_spill] sm:$0xff] %v3671_v16  ;;  %v4961_v31 = vrot.slane %v3410_v42, 7  ;;  %v4962_v49 = vrot.slane %v3392_v3, 7  ;;  %v1749_v10 = vsel %vm3662_vm14, %v1404_v36, %v1717_v9  ;;  %v4963_v18 = vrot.slane %v3396_v14, 7 }
 0x29e   :  { %4960 = vst [vmem:[#allocation36_spill] sm:$0xff] %v3681_v54  ;;  %v4964_v8 = vrot.slane %v3378_v7, 7  ;;  %v4966_v45 = vrot.slane %v3419_v23, 7  ;;  %v4967_v4 = vrot.slane %v3405_v32, 7  ;;  %vm3721_vm15 = vcmp.ne.s32.totalorder %v1168_v62, 0 }
 0x29f   :  { %v3694_v63 = vsel %vm1398_vm8, %v4962_v49, %v4961_v31  ;;  %v4969_v31 = vrot.slane %v3424_v60, 7  ;;  %v4970_v49 = vrot.slane %v3410_v42, 7  ;;  %v1064_v62 = vand.u32 3, %v3676_v57 }
 0x2a0   :  { %v3705_v28 = vsel %vm1398_vm8, %v4964_v8, %v4963_v18  ;;  %v3712_v16 = vsel %vm1398_vm8, %v4967_v4, %v4966_v45  ;;  %v1175_v18 = vand.u32 15, %v1045_v37  ;;  %v3726_v8 = vadd.f32 %v1749_v10, %v3271_v34 }
 0x2a1   :  { %4965 = vst [vmem:[#allocation37_spill] sm:$0xff] %v3705_v28  ;;  %v3719_v36 = vsel %vm1398_vm8, %v4970_v49, %v4969_v31  ;;  %v3729_v28 = vadd.f32 %v1746_v44, %v3308_v5  ;;  %v1750_v4 = vsel %vm3662_vm14, %v1406_v55, %v1718_v33  ;;  %v3735_v45 = vsel %vm1563_vm9, %v3457_v48, %v1520_v50  ;;  %v1534_v31 = vpop.permute.xlu0 %1533 }
 0x2a2   :  { %4968 = vst [vmem:[#allocation38_spill] sm:$0xff] %v3712_v16  ;;  %v3739_v49 = vadd.f32 %v1750_v4, %v3329_v43  ;;  %v1573_v34 = vsel %vm1563_vm9, %v1534_v31, %v3696_v24  ;;  %v1599_v5 = vsel %vm1563_vm9, %v3438_v58, %v1534_v31  ;;  %v4798_v37 = vrot.slane %v3681_v54, 4 }
 0x2a3   :  { %4971 = vst [vmem:[#allocation39_spill] sm:$0xff] %v3719_v36  ;;  %v4797_v55 = vrot.slane %v3726_v8, 4  ;;  %v3749_v48 = vsel %vm1563_vm9, %v1520_v50, %v3436_v13  ;;  %v1633_v44 = vrot.slane %v1599_v5, 3  ;;  %v1635_v33 = vrot.slane %v1573_v34, 3  ;;  %v3784_v5 = vpop.permute.xlu2 %1541 }
 0x2a4   :  { %4974 = vst [vmem:[#allocation40_spill] sm:$0xff] %v3726_v8  ;;  %v4806_v10 = vrot.slane %v3739_v49, 4  ;;  %vm3753_vm1 = vcmp.ne.s32.totalorder %v1175_v18, 0  ;;  %v4805_v57 = vrot.slane %v3729_v28, 4  ;;  %vm3764_vm2 = vcmp.ne.s32.totalorder %v1064_v62, 0 }
 0x2a5   :  { %4975 = vst [vmem:[#allocation41_spill] sm:$0xff] %v3729_v28  ;;  %v1855_v31 = vsel %vm1849_vm0, %v4798_v37, %v4797_v55  ;;  %v1634_v13 = vsel %vm1612_vm10, %v1625_v41, %v1633_v44  ;;  %v1036_v34 = vadd.s32 24, %v3508_v51  ;;  %v1636_v43 = vsel %vm1612_vm10, %v1627_v61, %v1635_v33  ;;  %v1526_v37 = vpop.permute.xlu1 %1525 }
 0x2a6   :  { %4976 = vst [vmem:[#allocation42_spill] sm:$0xff] %v3739_v49  ;;  %v2231_v18 = vadd.f32 %v1855_v31, %v3726_v8  ;;  %v1721_v55 = vsel %vm3548_vm11, %v1634_v13, %v3294_v2  ;;  %v1857_v41 = vsel %vm1849_vm0, %v4805_v57, %v4806_v10  ;;  %v1568_v62 = vsel %vm1563_vm9, %v3492_v6, %v1526_v37  ;;  %v5000_v10 = vld [vmem:[#allocation27_spill] sm:$0xff] }
 0x2a7   :  { %v1569_v31 = vsel %vm1563_vm9, %v1526_v37, %v3452_v53  ;;  %v1071_v61 = vand.u32 3, %v1036_v34  ;;  %v1620_v16 = vrot.slane %v1568_v62, 3  ;;  %v1753_v13 = vsel %vm3764_vm2, %v3545_v11, %v1721_v55 }
 0x2a8   :  { %v2263_v8 = vmul.f32 0.25, %v2231_v18  ;;  %v1623_v54 = vrot.slane %v1569_v31, 3  ;;  %v2232_v28 = vadd.f32 %v1857_v41, %v3739_v49  ;;  %v3798_v53 = vadd.f32 %v1753_v13, %v3294_v2 }
 0x2a9   :  { %v1540_v36 = vpop.permute.xlu0 %1539  ;;  %vm3790_vm3 = vcmp.ne.s32.totalorder %v1071_v61, 0  ;;  %v1722_v6 = vsel %vm3581_vm12, %v1636_v43, %v3352_v29  ;;  %v4983_v11 = vrot.slane %v3428_v39, 7  ;;  %v4984_v37 = vrot.slane %v3419_v23, 7 }
 0x2aa   :  { %2295 = vst [vmem:[%s4750_s5 + $0x20] sm:$0xff] %v2263_v8  ;;  %v4985_v34 = vrot.slane %v3735_v45, 3  ;;  %v4986_v8 = vrot.slane %v3749_v48, 3  ;;  %v1576_v41 = vsel %vm1563_vm9, %v1540_v36, %v3784_v5  ;;  %v1600_v43 = vsel %vm1563_vm9, %v3487_v38, %v1540_v36 }
 0x2ab   :  { %v3808_v55 = vsel %vm1398_vm8, %v4984_v37, %v4983_v11  ;;  %v1641_v31 = vrot.slane %v1600_v43, 3  ;;  %v1643_v61 = vrot.slane %v1576_v41, 3  ;;  %v1754_v36 = vsel %vm3764_vm2, %v3590_v20, %v1722_v6 }
 0x2ac   :  { %v1621_v18 = vsel %vm1612_vm10, %v4985_v34, %v1620_v16  ;;  %v1624_v2 = vsel %vm1612_vm10, %v4986_v8, %v1623_v54  ;;  %v2264_v34 = vmul.f32 0.25, %v2232_v28  ;;  %v4991_v20 = vrot.slane %v3424_v60, 7 }
 0x2ad   :  { %v1715_v62 = vsel %vm3721_vm15, %v1621_v18, %v3303_v1  ;;  %v1716_v13 = vsel %vm3753_vm1, %v1624_v2, %v3235_v21  ;;  %v1642_v18 = vsel %vm1612_vm10, %v1633_v44, %v1641_v31  ;;  %v1644_v8 = vsel %vm1612_vm10, %v1635_v33, %v1643_v61  ;;  %v3866_v33 = vpop.permute.xlu2 %1547 }
 0x2ae   :  { %v1748_v11 = vsel %vm3605_vm13, %v3482_v59, %v1716_v13  ;;  %v1747_v37 = vsel %vm3605_vm13, %v3537_v35, %v1715_v62  ;;  %v3841_v2 = vadd.s32 32, %v3508_v51  ;;  %v1532_v59 = vpop.permute.xlu1 %1531  ;;  %2296 = vst [vmem:[%s4750_s5 + $0x28] sm:$0xff] %v2264_v34  ;;  %v1725_v25 = vsel %vm3548_vm11, %v1642_v18, %v3315_v30 }
 0x2af   :  { %v3838_v41 = vadd.f32 %v1748_v11, %v3235_v21  ;;  %v3844_v43 = vadd.f32 %v1747_v37, %v3303_v1  ;;  %v1726_v21 = vsel %vm3581_vm12, %v1644_v8, %v3373_v46  ;;  %v4990_v35 = vrot.slane %v3432_v0, 7 }
 0x2b0   :  { %4988 = vst [vmem:[#allocation44_spill] sm:$0xff] %v3841_v2  ;;  %v1571_v1 = vsel %vm1563_vm9, %v3579_v17, %v1532_v59  ;;  %v1572_v44 = vsel %vm1563_vm9, %v1532_v59, %v3440_v22  ;;  %v4808_v6 = vrot.slane %v3798_v53, 4  ;;  %v3872_v62 = vadd.f32 %v1754_v36, %v3352_v29 }
 0x2b1   :  { %4987 = vst [vmem:[#allocation43_spill] sm:$0xff] %v3838_v41  ;;  %v3860_v28 = vsel %vm1398_vm8, %v4991_v20, %v4990_v35  ;;  %1942 = vrot.lane.b32.xlu0 %v3838_v41, %s2368_s8  ;;  %v1629_v13 = vrot.slane %v1571_v1, 3  ;;  %v1631_v11 = vrot.slane %v1572_v44, 3  ;;  %v1078_v37 = vand.u32 3, %v3841_v2  ;;  %v1546_v34 = vpop.permute.xlu0 %1545  ;;  %v4995_v44 = vld [vmem:[#allocation6_spill] sm:$0xff] }
 0x2b2   :  { %4989 = vst [vmem:[#allocation45_spill] sm:$0xff] %v3844_v43  ;;  %v1757_v17 = vsel %vm3790_vm3, %v3569_v12, %v1725_v25  ;;  %v4810_v22 = vrot.slane %v3838_v41, 4  ;;  %v1758_v29 = vsel %vm3790_vm3, %v3621_v15, %v1726_v21  ;;  %v1579_v35 = vsel %vm1563_vm9, %v1546_v34, %v3866_v33  ;;  %v4994_v12 = vld [vmem:[#allocation13_spill] sm:$0xff]  ;;  %v5005_v2 = vld [vmem:[#allocation10_spill] sm:$0xff] }
 0x2b3   :  { %4992 = vst [vmem:[#allocation46_spill] sm:$0xff] %v3872_v62  ;;  %v3881_v8 = vadd.f32 %v1757_v17, %v3315_v30  ;;  %v1630_v36 = vsel %vm1612_vm10, %v1620_v16, %v1629_v13  ;;  %v1632_v59 = vsel %vm1612_vm10, %v1623_v54, %v1631_v11  ;;  %v1601_v25 = vsel %vm1563_vm9, %v4994_v12, %v1546_v34  ;;  %v4996_v17 = vld [vmem:[#allocation8_spill] sm:$0xff]  ;;  %v4997_v21 = vld [vmem:[#allocation25_spill] sm:$0xff] }
 0x2b4   :  { %v1649_v20 = vrot.slane %v1601_v25, 3  ;;  %v1651_v1 = vrot.slane %v1579_v35, 3  ;;  %v1720_v30 = vsel %vm3753_vm1, %v1632_v59, %v4995_v44  ;;  %v1719_v15 = vsel %vm3721_vm15, %v1630_v36, %v4996_v17 }
 0x2b5   :  { %4993 = vst [vmem:[#allocation47_spill] sm:$0xff] %v3881_v8  ;;  %v1752_v16 = vsel %vm3662_vm14, %v4997_v21, %v1720_v30  ;;  %vm3901_vm4 = vcmp.ne.s32.totalorder %v1078_v37, 0  ;;  %v1751_v34 = vsel %vm3662_vm14, %v5000_v10, %v1719_v15  ;;  %v4807_v35 = vrot.slane %v3881_v8, 4  ;;  %v5002_v37 = vld [vmem:[#allocation9_spill] sm:$0xff]  ;;  %v3936_v15 = vpop.permute.xlu2 %1553 }
 0x2b6   :  { %v1650_v59 = vsel %vm1612_vm10, %v1641_v31, %v1649_v20  ;;  %v3911_v25 = vadd.f32 %v1752_v16, %v4995_v44  ;;  %v1038_v36 = vadd.s32 40, %v3508_v51  ;;  %v3915_v18 = vadd.f32 %v1758_v29, %v3373_v46  ;;  %v1538_v21 = vpop.permute.xlu1 %1537 }
 0x2b7   :  { %v1729_v30 = vsel %vm3548_vm11, %v1650_v59, %v5002_v37  ;;  %v3921_v56 = vadd.f32 %v1751_v34, %v4996_v17  ;;  %v1871_v10 = vsel %vm1849_vm0, %v4808_v6, %v4807_v35  ;;  %v3930_v44 = vsel %vm1612_vm10, %v1643_v61, %v1651_v1 }
 0x2b8   :  { %5001 = vst [vmem:[#allocation13_spill] sm:$0xff] %v3915_v18  ;;  %v1574_v46 = vsel %vm1563_vm9, %v3696_v24, %v1538_v21  ;;  %v1575_v29 = vsel %vm1563_vm9, %v1538_v21, %v3438_v58  ;;  %v4811_v17 = vrot.slane %v3911_v25, 4  ;;  %1944 = vrot.lane.b32.xlu2 %v3911_v25, %s2368_s8  ;;  %v1085_v59 = vand.u32 3, %v1038_v36  ;;  %v5004_v21 = vld [vmem:[#allocation29_spill] sm:$0xff] }
 0x2b9   :  { %5003 = vst [vmem:[#allocation6_spill] sm:$0xff] %v3921_v56  ;;  %v1637_v16 = vrot.slane %v1574_v46, 3  ;;  %v1639_v34 = vrot.slane %v1575_v29, 3  ;;  %v1552_v61 = vpop.permute.xlu0 %1551  ;;  %v2239_v58 = vadd.f32 %v1871_v10, %v3881_v8  ;;  %v1761_v6 = vsel %vm3901_vm4, %v5004_v21, %v1729_v30  ;;  %v5006_v10 = vld [vmem:[#allocation12_spill] sm:$0xff] }
 0x2ba   :  { %v1861_v24 = vsel %vm1849_vm0, %v4810_v22, %v4811_v17  ;;  %v1582_v35 = vsel %vm1563_vm9, %v1552_v61, %v3936_v15  ;;  %v1602_v17 = vsel %vm1563_vm9, %v5006_v10, %v1552_v61  ;;  %v5007_v30 = vld [vmem:[#allocation20_spill] sm:$0xff]  ;;  %vm3968_vm5 = vcmp.ne.s32.totalorder %v1085_v59, 0 }
 0x2bb   :  { %v1638_v46 = vsel %vm1612_vm10, %v1629_v13, %v1637_v16  ;;  %v1640_v36 = vsel %vm1612_vm10, %v1631_v11, %v1639_v34  ;;  %v2234_v29 = vadd.f32 %v1861_v24, %v3911_v25  ;;  %v1659_v8 = vrot.slane %v1582_v35, 3  ;;  %v5008_v11 = vld [vmem:[#allocation16_spill] sm:$0xff] }
 0x2bc   :  { %v1723_v22 = vsel %vm3721_vm15, %v1638_v46, %v5005_v2  ;;  %v1724_v21 = vsel %vm3753_vm1, %v1640_v36, %v5007_v30  ;;  %v1657_v31 = vrot.slane %v1602_v17, 3  ;;  %v5011_v46 = vrot.slane %v3921_v56, 4 }
 0x2bd   :  { %v2266_v13 = vmul.f32 0.25, %v2234_v29  ;;  %v1756_v24 = vsel %vm3764_vm2, %v5008_v11, %v1724_v21  ;;  %v5012_v41 = vrot.slane %v3844_v43, 4  ;;  %v1040_v36 = vadd.s32 56, %v3508_v51  ;;  %v4011_v50 = vpop.permute.xlu2 %1559 }
 0x2be   :  { %v3978_v61 = vadd.f32 %v1756_v24, %v5007_v30  ;;  %v3982_v17 = vadd.s32 48, %v3508_v51  ;;  %v5014_v29 = vrot.slane %v3915_v18, 4  ;;  %v5015_v59 = vrot.slane %v3872_v62, 4  ;;  %v1544_v30 = vpop.permute.xlu1 %1543 }
 0x2bf   :  { %v1859_v35 = vsel %vm1849_vm0, %v5012_v41, %v5011_v46  ;;  %2298 = vst [vmem:[%s4750_s5 + $0x38] sm:$0xff] %v2266_v13  ;;  %v3993_v41 = vsel %vm1612_vm10, %v1651_v1, %v1659_v8  ;;  %v2271_v24 = vmul.f32 0.25, %v2239_v58  ;;  %v5016_v46 = vld [vmem:[#allocation28_spill] sm:$0xff]  ;;  %v1658_v43 = vsel %vm1612_vm10, %v1649_v20, %v1657_v31 }
 0x2c0   :  { %5013 = vst [vmem:[#allocation8_spill] sm:$0xff] %v3982_v17  ;;  %v1873_v21 = vsel %vm1849_vm0, %v5015_v59, %v5014_v29  ;;  %v2233_v11 = vadd.f32 %v1859_v35, %v3921_v56  ;;  %v1755_v51 = vsel %vm3764_vm2, %v5016_v46, %v1723_v22  ;;  %v1577_v29 = vsel %vm1563_vm9, %v3784_v5, %v1544_v30 }
 0x2c1   :  { %v1578_v59 = vsel %vm1563_vm9, %v1544_v30, %v3487_v38  ;;  %1946 = vrot.lane.b32.xlu1 %v3978_v61, %s2368_s8  ;;  %v1645_v13 = vrot.slane %v1577_v29, 3  ;;  %v1092_v58 = vand.u32 3, %v3982_v17  ;;  %2303 = vst [vmem:[%s4750_s5 + $0x60] sm:$0xff] %v2271_v24  ;;  %v1558_v5 = vpop.permute.xlu0 %1557  ;;  %v1099_v22 = vand.u32 3, %v1040_v36  ;;  %v5017_v24 = vld [vmem:[#allocation3_spill] sm:$0xff] }
 0x2c2   :  { %v1647_v35 = vrot.slane %v1578_v59, 3  ;;  %v2265_v56 = vmul.f32 0.25, %v2233_v11  ;;  %v4014_v38 = vadd.f32 %v1755_v51, %v5005_v2  ;;  %v4017_v20 = vadd.f32 %v1761_v6, %v5002_v37  ;;  %v5018_v6 = vld [vmem:[#allocation15_spill] sm:$0xff] }
 0x2c3   :  { %v2240_v30 = vadd.f32 %v1873_v21, %v3915_v18  ;;  %v1646_v46 = vsel %vm1612_vm10, %v1637_v16, %v1645_v13  ;;  %v1585_v29 = vsel %vm1563_vm9, %v1558_v5, %v4011_v50  ;;  %v1603_v59 = vsel %vm1563_vm9, %v5017_v24, %v1558_v5  ;;  %v5022_v21 = vld [vmem:[#allocation11_spill] sm:$0xff]  ;;  %v5025_v18 = vld [vmem:[#allocation4_spill] sm:$0xff] }
 0x2c4   :  { %v1648_v11 = vsel %vm1612_vm10, %v1639_v34, %v1647_v35  ;;  %2297 = vst [vmem:[%s4750_s5 + $0x30] sm:$0xff] %v2265_v56  ;;  %v1665_v51 = vrot.slane %v1603_v59, 3  ;;  %v1667_v2 = vrot.slane %v1585_v29, 3  ;;  %vm4032_vm6 = vcmp.ne.s32.totalorder %v1092_v58, 0  ;;  %v5021_v34 = vld [vmem:[#allocation17_spill] sm:$0xff]  ;;  %v5023_v58 = vld [vmem:[#allocation19_spill] sm:$0xff] }
 0x2c5   :  { %v1728_v37 = vsel %vm3753_vm1, %v1648_v11, %v5018_v6  ;;  %v1727_v5 = vsel %vm3721_vm15, %v1646_v46, %v5022_v21  ;;  %v1866_v56 = vrot.slane %v4014_v38, 4  ;;  %v2272_v59 = vmul.f32 0.25, %v2240_v30 }
 0x2c6   :  { %v1760_v36 = vsel %vm3790_vm3, %v5021_v34, %v1728_v37  ;;  %v1666_v29 = vsel %vm1612_vm10, %v1657_v31, %v1665_v51  ;;  %v4045_v1 = vsel %vm1612_vm10, %v1659_v8, %v1667_v2  ;;  %v5024_v11 = vrot.slane %v5023_v58, 3  ;;  %v1550_v30 = vpop.permute.xlu1 %1549  ;;  %v5027_v8 = vld [vmem:[#allocation31_spill] sm:$0xff] }
 0x2c7   :  { %v5026_v62 = vrot.slane %v5025_v18, 3  ;;  %v1737_v46 = vsel %vm3548_vm11, %v1666_v29, %v3378_v7  ;;  %v4061_v31 = vadd.f32 %v1760_v36, %v5018_v6  ;;  %v1759_v34 = vsel %vm3790_vm3, %v5027_v8, %v1727_v5  ;;  %2304 = vst [vmem:[%s4750_s5 + $0x68] sm:$0xff] %v2272_v59  ;;  %v5028_v6 = vld [vmem:[#allocation32_spill] sm:$0xff] }
 0x2c8   :  { %v4050_v17 = vsel %vm1612_vm10, %v1665_v51, %v5024_v11  ;;  %v1580_v18 = vsel %vm1563_vm9, %v3866_v33, %v1550_v30  ;;  %v1581_v51 = vsel %vm1563_vm9, %v1550_v30, %v4994_v12  ;;  %vm4085_vm7 = vcmp.ne.s32.totalorder %v1099_v22, 0 }
 0x2c9   :  { %v4055_v37 = vsel %vm1612_vm10, %v1667_v2, %v5026_v62  ;;  %v1733_v62 = vsel %vm3548_vm11, %v1658_v43, %v3357_v52  ;;  %v4077_v2 = vadd.f32 %v1759_v34, %v5022_v21  ;;  %v1653_v36 = vrot.slane %v1580_v18, 3  ;;  %1948 = vrot.lane.b32.xlu0 %v4061_v31, %s2368_s8 }
 0x2ca   :  { %v1765_v57 = vsel %vm3968_vm5, %v5028_v6, %v1733_v62  ;;  %v1655_v5 = vrot.slane %v1581_v51, 3  ;;  %v1876_v43 = vrot.slane %v4061_v31, 4  ;;  %v1878_v21 = vrot.slane %v4017_v20, 4  ;;  %v5032_v62 = vld [vmem:[#allocation21_spill] sm:$0xff] }
 0x2cb   :  { %v4090_v33 = vadd.f32 %v1765_v57, %v3357_v52  ;;  %v4828_v12 = vrot.slane %v4077_v2, 4  ;;  %v1730_v29 = vsel %vm3581_vm12, %v3930_v44, %v3392_v3  ;;  %v1769_v58 = vsel %vm4032_vm6, %v3658_v27, %v1737_v46  ;;  %v5034_v6 = vld [vmem:[#allocation33_spill] sm:$0xff] }
 0x2cc   :  { %v1654_v22 = vsel %vm1612_vm10, %v1645_v13, %v1653_v36  ;;  %v1656_v11 = vsel %vm1612_vm10, %v1647_v35, %v1655_v5  ;;  %v5031_v52 = vrot.slane %v3978_v61, 4  ;;  %v5033_v35 = vld [vmem:[#allocation18_spill] sm:$0xff]  ;;  %v1742_v49 = vsel %vm3581_vm12, %v4055_v37, %v3432_v0 }
 0x2cd   :  { %v1886_v8 = vrot.slane %v4090_v33, 4  ;;  %v1731_v44 = vsel %vm3721_vm15, %v1654_v22, %v3387_v19  ;;  %v1732_v27 = vsel %vm3753_vm1, %v1656_v11, %v5032_v62  ;;  %v1875_v13 = vsel %vm1849_vm0, %v1866_v56, %v4828_v12 }
 0x2ce   :  { %v1877_v30 = vsel %vm1849_vm0, %v5031_v52, %v1876_v43  ;;  %v1764_v46 = vsel %vm3901_vm4, %v5033_v35, %v1732_v27  ;;  %v2241_v18 = vadd.f32 %v1875_v13, %v4077_v2  ;;  %v1763_v57 = vsel %vm3901_vm4, %v5034_v6, %v1731_v44  ;;  %v1556_v27 = vpop.permute.xlu1 %1555  ;;  %v5035_v6 = vld [vmem:[#allocation5_spill] sm:$0xff] }
 0x2cf   :  { %v2242_v34 = vadd.f32 %v1877_v30, %v4061_v31  ;;  %v1887_v51 = vsel %vm1849_vm0, %v1878_v21, %v1886_v8  ;;  %v4134_v11 = vadd.f32 %v1764_v46, %v5032_v62  ;;  %v4138_v30 = vadd.f32 %v1763_v57, %v3387_v19  ;;  %v5036_v57 = vld [vmem:[#allocation37_spill] sm:$0xff] }
 0x2d0   :  { %v2247_v52 = vadd.f32 %v1887_v51, %v4090_v33  ;;  %v2273_v13 = vmul.f32 0.25, %v2241_v18  ;;  %v1762_v35 = vsel %vm3901_vm4, %v3649_v26, %v1730_v29  ;;  %v4144_v12 = vadd.f32 %v1769_v58, %v3378_v7 }
 0x2d1   :  { %v2274_v22 = vmul.f32 0.25, %v2242_v34  ;;  %v1734_v44 = vsel %vm3581_vm12, %v3993_v41, %v3410_v42  ;;  %v1583_v19 = vsel %vm1563_vm9, %v3936_v15, %v1556_v27  ;;  %v1584_v34 = vsel %vm1563_vm9, %v1556_v27, %v5006_v10  ;;  %1950 = vrot.lane.b32.xlu2 %v4134_v11, %s2368_s8 }
 0x2d2   :  { %v1884_v26 = vrot.slane %v4134_v11, 4  ;;  %v2279_v7 = vmul.f32 0.25, %v2247_v52  ;;  %v1661_v54 = vrot.slane %v1583_v19, 3  ;;  %v1663_v29 = vrot.slane %v1584_v34, 3  ;;  %2305 = vst [vmem:[%s4750_s5 + $0x70] sm:$0xff] %v2273_v13  ;;  %v5039_v52 = vld [vmem:[#allocation34_spill] sm:$0xff] }
 0x2d3   :  { %2306 = vst [vmem:[%s4750_s5 + $0x78] sm:$0xff] %v2274_v22  ;;  %v4164_v41 = vadd.f32 %v1762_v35, %v3392_v3  ;;  %v1882_v15 = vrot.slane %v4138_v30, 4  ;;  %v1766_v10 = vsel %vm3968_vm5, %v3694_v63, %v1734_v44  ;;  %v1741_v58 = vsel %vm3548_vm11, %v4050_v17, %v3396_v14  ;;  %v5038_v22 = vld [vmem:[#allocation22_spill] sm:$0xff] }
 0x2d4   :  { %2311 = vst [vmem:[%s4750_s5 + $0xa0] sm:$0xff] %v2279_v7  ;;  %v1894_v62 = vrot.slane %v4144_v12, 4  ;;  %v1738_v3 = vsel %vm3581_vm12, %v4045_v1, %v3424_v60  ;;  %v1662_v46 = vsel %vm1612_vm10, %v1653_v36, %v1661_v54  ;;  %v1664_v18 = vsel %vm1612_vm10, %v1655_v5, %v1663_v29  ;;  %v5037_v36 = vld [vmem:[#allocation39_spill] sm:$0xff] }
 0x2d5   :  { %v1880_v51 = vrot.slane %v4164_v41, 4  ;;  %v4186_v63 = vadd.f32 %v1766_v10, %v3410_v42  ;;  %v1736_v47 = vsel %vm3753_vm1, %v1664_v18, %v5035_v6  ;;  %v1735_v17 = vsel %vm3721_vm15, %v1662_v46, %v3405_v32 }
 0x2d6   :  { %v1773_v1 = vsel %vm4085_vm7, %v5036_v57, %v1741_v58  ;;  %v1770_v5 = vsel %vm4032_vm6, %v5037_v36, %v1738_v3  ;;  %v1768_v42 = vsel %vm3968_vm5, %v5038_v22, %v1736_v47  ;;  %v1767_v27 = vsel %vm3968_vm5, %v5039_v52, %v1735_v17  ;;  %v1562_v7 = vpop.permute.xlu1 %1561  ;;  %v5042_v17 = vld [vmem:[#allocation36_spill] sm:$0xff] }
 0x2d7   :  { %v1888_v13 = vrot.slane %v4186_v63, 4  ;;  %v4208_v35 = vadd.f32 %v1773_v1, %v3396_v14  ;;  %v4211_v44 = vadd.f32 %v1768_v42, %v5035_v6  ;;  %v4214_v19 = vadd.f32 %v1767_v27, %v3405_v32 }
 0x2d8   :  { %v4217_v34 = vadd.f32 %v1770_v5, %v3424_v60  ;;  %v1774_v32 = vsel %vm4085_vm7, %v3860_v28, %v1742_v49  ;;  %v5040_v60 = vrot.slane %v3978_v61, 4  ;;  %v5041_v58 = vrot.slane %v3911_v25, 4 }
 0x2d9   :  { %v1889_v14 = vsel %vm1849_vm0, %v1880_v51, %v1888_v13  ;;  %v1813_v10 = vrot.slane %v4208_v35, 4  ;;  %v1586_v37 = vsel %vm1563_vm9, %v4011_v50, %v1562_v7  ;;  %v1587_v3 = vsel %vm1563_vm9, %v1562_v7, %v5017_v24  ;;  %1952 = vrot.lane.b32.xlu1 %v4211_v44, %s2368_s8 }
 0x2da   :  { %v4237_v40 = vsel %vm1849_vm0, %v5041_v58, %v5040_v60  ;;  %v1892_v46 = vrot.slane %v4211_v44, 4  ;;  %v1890_v28 = vrot.slane %v4214_v19, 4  ;;  %v1669_v18 = vrot.slane %v1586_v37, 3  ;;  %v5047_v60 = vld [vmem:[#allocation7_spill] sm:$0xff]  ;;  %v5049_v58 = vld [vmem:[#allocation2_spill] sm:$0xff] }
 0x2db   :  { %v1671_v6 = vrot.slane %v1587_v3, 3  ;;  %v2248_v25 = vadd.f32 %v1889_v14, %v4186_v63  ;;  %v1902_v47 = vsel %vm1849_vm0, %v1894_v62, %v1813_v10  ;;  %v5043_v57 = vrot.slane %v5042_v17, 4 }
 0x2dc   :  { %v1893_v50 = vsel %vm1849_vm0, %v1884_v26, %v1892_v46  ;;  %v1891_v24 = vsel %vm1849_vm0, %v1882_v15, %v1890_v28  ;;  %v2255_v36 = vadd.f32 %v1902_v47, %v4208_v35  ;;  %v1670_v5 = vsel %vm1612_vm10, %v1661_v54, %v1669_v18 }
 0x2dd   :  { %v4264_v1 = vsel %vm1849_vm0, %v1813_v10, %v5043_v57  ;;  %v1672_v22 = vsel %vm1612_vm10, %v1663_v29, %v1671_v6  ;;  %v5044_v42 = vrot.slane %v3735_v45, 3  ;;  %v5045_v27 = vrot.slane %v3749_v48, 3  ;;  %v5046_v10 = vld [vmem:[#allocation23_spill] sm:$0xff]  ;;  %v5048_v29 = vld [vmem:[#allocation24_spill] sm:$0xff] }
 0x2de   :  { %v1739_v7 = vsel %vm3721_vm15, %v1670_v5, %v3419_v23  ;;  %v2250_v14 = vadd.f32 %v1893_v50, %v4211_v44  ;;  %v1740_v45 = vsel %vm3753_vm1, %v1672_v22, %v5047_v60  ;;  %v2249_v3 = vadd.f32 %v1891_v24, %v4214_v19  ;;  %v5050_v5 = vld [vmem:[#allocation38_spill] sm:$0xff] }
 0x2df   :  { %v1711_v52 = vsel %vm1612_vm10, %v1669_v18, %v5044_v42  ;;  %v1712_v49 = vsel %vm1612_vm10, %v1671_v6, %v5045_v27  ;;  %v1772_v37 = vsel %vm4032_vm6, %v5049_v58, %v1740_v45  ;;  %v2280_v18 = vmul.f32 0.25, %v2248_v25 }
 0x2e0   :  { %v1744_v54 = vsel %vm3753_vm1, %v1712_v49, %v5046_v10  ;;  %v2282_v6 = vmul.f32 0.25, %v2250_v14  ;;  %v4294_v50 = vadd.f32 %v1772_v37, %v5047_v60  ;;  %v2287_v57 = vmul.f32 0.25, %v2255_v36  ;;  %v5058_v60 = vld [vmem:[#allocation42_spill] sm:$0xff] }
 0x2e1   :  { %v1776_v48 = vsel %vm4085_vm7, %v5048_v29, %v1744_v54  ;;  %v2281_v4 = vmul.f32 0.25, %v2249_v3  ;;  %2312 = vst [vmem:[%s4750_s5 + $0xa8] sm:$0xff] %v2280_v18  ;;  %v1771_v22 = vsel %vm4032_vm6, %v5050_v5, %v1739_v7  ;;  %v1896_v42 = vrot.slane %v4217_v34, 4  ;;  %1966 = vrot.lane.b32.xlu1 %v5042_v17, %s2368_s8  ;;  %v5052_v7 = vld [vmem:[#allocation40_spill] sm:$0xff]  ;;  %v5060_v3 = vld [vmem:[#allocation6_spill] sm:$0xff] }
 0x2e2   :  { %v1808_v47 = vadd.f32 %v1776_v48, %v5046_v10  ;;  %v1743_v25 = vsel %vm3721_vm15, %v1711_v52, %v3428_v39  ;;  %2314 = vst [vmem:[%s4750_s5 + $0xb8] sm:$0xff] %v2282_v6  ;;  %1954 = vrot.lane.b32.xlu0 %v4294_v50, %s2368_s8  ;;  %v1900_v36 = vrot.slane %v4294_v50, 4  ;;  %v4314_v16 = vadd.f32 %v1771_v22, %v3419_v23  ;;  %v5054_v10 = vld [vmem:[#allocation43_spill] sm:$0xff]  ;;  %v5064_v22 = vld [vmem:[#allocation13_spill] sm:$0xff] }
 0x2e3   :  { %v1775_v9 = vsel %vm4085_vm7, %v3808_v55, %v1743_v25  ;;  %2313 = vst [vmem:[%s4750_s5 + $0xb0] sm:$0xff] %v2281_v4  ;;  %v1806_v27 = vadd.f32 %v1774_v32, %v3432_v0  ;;  %v5051_v49 = vrot.slane %v3798_v53, 4  ;;  %v5053_v23 = vrot.slane %v5052_v7, 4  ;;  %v5056_v0 = vld [vmem:[#allocation46_spill] sm:$0xff] }
 0x2e4   :  { %1956 = vrot.lane.b32.xlu2 %v1808_v47, %s2368_s8  ;;  %v1816_v24 = vrot.slane %v1808_v47, 4  ;;  %v1807_v52 = vadd.f32 %v1775_v9, %v3428_v39  ;;  %2319 = vst [vmem:[%s4750_s5 + $0xe0] sm:$0xff] %v2287_v57  ;;  %v1898_v59 = vrot.slane %v4314_v16, 4  ;;  %v5055_v54 = vrot.slane %v5054_v10, 4  ;;  %v5062_v57 = vld [vmem:[#allocation47_spill] sm:$0xff]  ;;  %v5066_v9 = vld [vmem:[#allocation45_spill] sm:$0xff] }
 0x2e5   :  { %v4331_v14 = vsel %vm1849_vm0, %v5053_v23, %v5051_v49  ;;  %v5057_v32 = vrot.slane %v5056_v0, 4  ;;  %v5059_v45 = vrot.slane %v5058_v60, 4  ;;  %v1814_v37 = vrot.slane %v1806_v27, 4 }
 0x2e6   :  { %v1905_v55 = vsel %vm1849_vm0, %v1900_v36, %v1816_v24  ;;  %v4341_v39 = vsel %vm1849_vm0, %v1816_v24, %v5055_v54  ;;  %v1815_v58 = vrot.slane %v1807_v52, 4  ;;  %v5061_v18 = vrot.slane %v5060_v3, 4 }
 0x2e7   :  { %v4348_v29 = vsel %vm1849_vm0, %v5059_v45, %v5057_v32  ;;  %v2258_v48 = vadd.f32 %v1905_v55, %v1808_v47  ;;  %v5063_v4 = vrot.slane %v5062_v57, 4  ;;  %v4369_v47 = vsel %vm1849_vm0, %v1886_v8, %v1894_v62  ;;  %v5068_v32 = vld [vmem:[#allocation41_spill] sm:$0xff] }
 0x2e8   :  { %v4355_v6 = vsel %vm1849_vm0, %v5061_v18, %v1866_v56  ;;  %v5065_v25 = vrot.slane %v5064_v22, 4  ;;  %v4381_v24 = vsel %vm1849_vm0, %v1888_v13, %v1896_v42  ;;  %v5067_v49 = vrot.slane %v5066_v9, 4 }
 0x2e9   :  { %v4362_v5 = vsel %vm1849_vm0, %v5063_v4, %v1878_v21  ;;  %v2290_v21 = vmul.f32 0.25, %v2258_v48  ;;  %v1904_v8 = vsel %vm1849_vm0, %v1898_v59, %v1815_v58  ;;  %v1903_v62 = vsel %vm1849_vm0, %v1896_v42, %v1814_v37  ;;  %1972 = vrot.lane.b32.xlu1 %v5052_v7, %s2368_s8 }
 0x2ea   :  { %v4376_v56 = vsel %vm1849_vm0, %v5065_v25, %v1880_v51  ;;  %v4386_v23 = vsel %vm1849_vm0, %v1815_v58, %v5067_v49  ;;  %v2257_v55 = vadd.f32 %v1904_v8, %v1807_v52  ;;  %v2256_v54 = vadd.f32 %v1903_v62, %v1806_v27  ;;  %1968 = vrot.lane.b32.xlu0 %v5068_v32, %s2368_s8 }
 0x2eb   :  { %v5069_v51 = vrot.slane %v5068_v32, 4  ;;  %2322 = vst [vmem:[%s4750_s5 + $0xf8] sm:$0xff] %v2290_v21  ;;  %v4403_v13 = vsel %vm1849_vm0, %v1876_v43, %v1884_v26  ;;  %v5070_v58 = vrot.slane %v4077_v2, 4  ;;  %v4437_v31 = vsel %vm1849_vm0, %v1892_v46, %v1900_v36 }
 0x2ec   :  { %1970 = vrot.lane.b32.xlu2 %v5066_v9, %s2368_s8  ;;  %v2289_v42 = vmul.f32 0.25, %v2257_v55  ;;  %v2288_v48 = vmul.f32 0.25, %v2256_v54  ;;  %v4442_v43 = vsel %vm1849_vm0, %v1890_v28, %v1898_v59  ;;  %vm2014_vm8 = vcmask 130048   ;;  %v5074_v54 = vld [vmem:[#allocation35_spill] sm:$0xff] }
 0x2ed   :  { %v4393_v45 = vsel %vm1849_vm0, %v1814_v37, %v5069_v51  ;;  %v4414_v37 = vsel %vm1849_vm0, %v5070_v58, %v1882_v15  ;;  %v1220_v51 = vand.u32 15, %v5074_v54 }
 0x2ee   :  { %2321 = vst [vmem:[%s4750_s5 + $0xf0] sm:$0xff] %v2289_v42 }
 0x2ef   :  { %2320 = vst [vmem:[%s4750_s5 + $0xe8] sm:$0xff] %v2288_v48  ;;  %vm4524_vm10 = vcmp.ge.s32.totalorder %v1220_v51, 4 }
 0x2f1   :  { %1978 = vrot.lane.b32.xlu1 %v3798_v53, %s2368_s8 }
 0x2f2   :  { %1974 = vrot.lane.b32.xlu0 %v5058_v60, %s2368_s8 }
 0x2f4   :  { %1976 = vrot.lane.b32.xlu2 %v5060_v3, %s2368_s8 }
 0x2f9   :  { %1984 = vrot.lane.b32.xlu1 %v5062_v57, %s2368_s8 }
 0x2fa   :  { %1980 = vrot.lane.b32.xlu0 %v5056_v0, %s2368_s8 }
 0x2fc   :  { %1982 = vrot.lane.b32.xlu2 %v4014_v38, %s2368_s8 }
 0x301   :  { %1990 = vrot.lane.b32.xlu1 %v4017_v20, %s2368_s8 }
 0x302   :  { %1986 = vrot.lane.b32.xlu0 %v5064_v22, %s2368_s8 }
 0x304   :  { %1988 = vrot.lane.b32.xlu2 %v4077_v2, %s2368_s8 }
 0x309   :  { %1996 = vrot.lane.b32.xlu1 %v4090_v33, %s2368_s8 }
 0x30a   :  { %1992 = vrot.lane.b32.xlu0 %v4164_v41, %s2368_s8 }
 0x30c   :  { %1994 = vrot.lane.b32.xlu2 %v4138_v30, %s2368_s8 }
 0x311   :  { %2002 = vrot.lane.b32.xlu1 %v4144_v12, %s2368_s8 }
 0x312   :  { %1998 = vrot.lane.b32.xlu0 %v4186_v63, %s2368_s8  ;;  %v1945_v2 = vpop.permute.xlu2 %1944 }
 0x314   :  { %2000 = vrot.lane.b32.xlu2 %v4214_v19, %s2368_s8 }
 0x319   :  { %2008 = vrot.lane.b32.xlu1 %v4208_v35, %s2368_s8  ;;  %v5071_v35 = vld [vmem:[#allocation26_spill] sm:$0xff] }
 0x31a   :  { %2004 = vrot.lane.b32.xlu0 %v4217_v34, %s2368_s8  ;;  %v1206_v36 = vand.u32 15, %v5071_v35 }
 0x31c   :  { %2006 = vrot.lane.b32.xlu2 %v4314_v16, %s2368_s8  ;;  %vm4491_vm9 = vcmp.ge.s32.totalorder %v1206_v36, 4 }
 0x322   :  { %2010 = vrot.lane.b32.xlu0 %v1806_v27, %s2368_s8 }
 0x323   :  { %v4476_v15 = vpop.permute.xlu0 %1942 }
 0x324   :  { %2012 = vrot.lane.b32.xlu2 %v1807_v52, %s2368_s8 }
 0x32b   :  { %v4472_v33 = vpop.permute.xlu2 %1950 }
 0x333   :  { %v1947_v63 = vpop.permute.xlu1 %1946 }
 0x33b   :  { %v4480_v19 = vpop.permute.xlu0 %1948 }
 0x33e   :  { %v4474_v26 = vpop.permute.xlu2 %1956 }
 0x346   :  { %v4478_v44 = vpop.permute.xlu2 %1970 }
 0x34b   :  { %v4482_v46 = vpop.permute.xlu1 %1952 }
 0x34e   :  { %v1977_v28 = vpop.permute.xlu2 %1976 }
 0x34f   :  { %v2020_v52 = vsel %vm2014_vm8, %v1977_v28, %v1945_v2 }
 0x350   :  { %v2071_v3 = vrot.slane %v2020_v52, 4 }
 0x353   :  { %v4488_v59 = vpop.permute.xlu1 %1966 }
 0x354   :  { %v4486_v27 = vpop.permute.xlu0 %1954 }
 0x356   :  { %v1983_v7 = vpop.permute.xlu2 %1982 }
 0x357   :  { %v2023_v60 = vsel %vm2014_vm8, %v1983_v7, %v1947_v63 }
 0x358   :  { %v2072_v57 = vrot.slane %v2023_v60, 4 }
 0x35a   :  { %v2073_v4 = vsel %vm1849_vm0, %v2071_v3, %v2072_v57 }
 0x35b   :  { %v2198_v22 = vsel %vm4491_vm9, %v4341_v39, %v2073_v4  ;;  %v1973_v62 = vpop.permute.xlu1 %1972  ;;  %v5075_v39 = vld [vmem:[#allocation14_spill] sm:$0xff] }
 0x35c   :  { %v2230_v25 = vadd.f32 %v2198_v22, %v5054_v10  ;;  %v4500_v49 = vpop.permute.xlu0 %1968  ;;  %v1310_v42 = vand.u32 255, %v5075_v39  ;;  %v2048_v48 = vsel %vm2014_vm8, %v1945_v2, %v1973_v62 }
 0x35d   :  { %v4507_v55 = vsel %vm2014_vm8, %v4500_v49, %v4478_v44  ;;  %v2062_v22 = vrot.slane %v2048_v48, 4 }
 0x35e   :  { %v2262_v21 = vmul.f32 0.25, %v2230_v25  ;;  %v4502_v8 = vpop.permute.xlu2 %1988  ;;  %vm4528_vm11 = vcmp.ge.s32.totalorder %v1310_v42, 16 }
 0x35f   :  { %v2026_v10 = vsel %vm2014_vm8, %v4502_v8, %v4480_v19 }
 0x360   :  { %2294 = vst [vmem:[%s4750_s5 + $0x18] sm:$0xff] %v2262_v21  ;;  %v2080_v60 = vrot.slane %v2026_v10, 4 }
 0x363   :  { %v1979_v36 = vpop.permute.xlu1 %1978 }
 0x364   :  { %v1975_v58 = vpop.permute.xlu0 %1974  ;;  %v2049_v3 = vsel %vm2014_vm8, %v1947_v63, %v1979_v36  ;;  %v5080_v63 = vld [vmem:[#allocation30_spill] sm:$0xff] }
 0x365   :  { %v2063_v2 = vrot.slane %v2049_v3, 4  ;;  %v1324_v51 = vand.u32 255, %v5080_v63  ;;  %v2018_v42 = vsel %vm2014_vm8, %v1973_v62, %v1975_v58 }
 0x366   :  { %v4518_v35 = vpop.permute.xlu2 %1994 }
 0x367   :  { %v2029_v52 = vsel %vm2014_vm8, %v4518_v35, %v4472_v33  ;;  %v2064_v54 = vsel %vm1849_vm0, %v2062_v22, %v2063_v2  ;;  %v2065_v2 = vrot.slane %v2018_v42, 4  ;;  %vm4550_vm12 = vcmp.ge.s32.totalorder %v1324_v51, 16  ;;  %v5083_v42 = vld [vmem:[#allocation44_spill] sm:$0xff] }
 0x368   :  { %v2088_v4 = vrot.slane %v2029_v52, 4  ;;  %v2163_v39 = vsel %vm4528_vm11, %v2064_v54, %v5042_v17 }
 0x369   :  { %v2195_v52 = vsel %vm4491_vm9, %v4264_v1, %v2163_v39 }
 0x36a   :  { %v2089_v21 = vsel %vm1849_vm0, %v2080_v60, %v2088_v4  ;;  %v2019_v60 = vsel %vm2014_vm8, %v1975_v58, %v1977_v28  ;;  %v2227_v3 = vadd.f32 %v2195_v52, %v5042_v17 }
 0x36b   :  { %v2206_v10 = vsel %vm4524_vm10, %v4237_v40, %v2089_v21  ;;  %v1985_v21 = vpop.permute.xlu1 %1984  ;;  %v2068_v1 = vrot.slane %v2019_v60, 4 }
 0x36c   :  { %v2238_v48 = vadd.f32 %v2206_v10, %v3978_v61  ;;  %v1981_v40 = vpop.permute.xlu0 %1980  ;;  %v2259_v10 = vmul.f32 0.25, %v2227_v3  ;;  %v2050_v3 = vsel %vm2014_vm8, %v4480_v19, %v1985_v21 }
 0x36d   :  { %v2021_v61 = vsel %vm2014_vm8, %v1979_v36, %v1981_v40  ;;  %v2022_v62 = vsel %vm2014_vm8, %v1981_v40, %v1983_v7 }
 0x36e   :  { %v2270_v4 = vmul.f32 0.25, %v2238_v48  ;;  %v4548_v22 = vpop.permute.xlu2 %2000  ;;  %v2066_v17 = vrot.slane %v2021_v61, 4  ;;  %v2069_v28 = vrot.slane %v2022_v62, 4  ;;  %2291 = vst [vmem:[%s4750_s5] sm:$0xff] %v2259_v10  ;;  %v1234_v48 = vand.u32 15, %v5083_v42 }
 0x36f   :  { %v2032_v60 = vsel %vm2014_vm8, %v4548_v22, %v4482_v46  ;;  %v2074_v62 = vrot.slane %v2050_v3, 4 }
 0x370   :  { %2302 = vst [vmem:[%s4750_s5 + $0x58] sm:$0xff] %v2270_v4  ;;  %v2067_v58 = vsel %vm1849_vm0, %v2065_v2, %v2066_v17  ;;  %v2070_v63 = vsel %vm1849_vm0, %v2068_v1, %v2069_v28  ;;  %vm4591_vm13 = vcmp.ge.s32.totalorder %v1234_v48, 4 }
 0x371   :  { %v2165_v7 = vsel %vm4550_vm12, %v2070_v63, %v5066_v9  ;;  %v2196_v36 = vsel %vm4491_vm9, %v4393_v45, %v2067_v58 }
 0x372   :  { %v2197_v51 = vsel %vm4491_vm9, %v4386_v23, %v2165_v7  ;;  %v2228_v39 = vadd.f32 %v2196_v36, %v5068_v32 }
 0x373   :  { %v2229_v52 = vadd.f32 %v2197_v51, %v5066_v9  ;;  %v1991_v18 = vpop.permute.xlu1 %1990  ;;  %v2096_v9 = vrot.slane %v2032_v60, 4  ;;  %v5086_v51 = vld [vmem:[#allocation8_spill] sm:$0xff] }
 0x374   :  { %v2260_v4 = vmul.f32 0.25, %v2228_v39  ;;  %v1987_v40 = vpop.permute.xlu0 %1986  ;;  %v2051_v32 = vsel %vm2014_vm8, %v4472_v33, %v1991_v18  ;;  %v1248_v39 = vand.u32 15, %v5086_v51 }
 0x375   :  { %v2261_v2 = vmul.f32 0.25, %v2229_v52  ;;  %v2082_v10 = vrot.slane %v2051_v32, 4  ;;  %v2024_v58 = vsel %vm2014_vm8, %v1985_v21, %v1987_v40  ;;  %v2025_v36 = vsel %vm2014_vm8, %v1987_v40, %v4502_v8 }
 0x376   :  { %v4581_v45 = vpop.permute.xlu2 %2006  ;;  %2292 = vst [vmem:[%s4750_s5 + $0x8] sm:$0xff] %v2260_v4  ;;  %v2078_v40 = vrot.slane %v2025_v36, 4  ;;  %vm4629_vm14 = vcmp.ge.s32.totalorder %v1248_v39, 4  ;;  %v2047_v39 = vsel %vm2014_vm8, %v4476_v15, %v4488_v59 }
 0x377   :  { %v2035_v23 = vsel %vm2014_vm8, %v4581_v45, %v4486_v27  ;;  %2293 = vst [vmem:[%s4750_s5 + $0x10] sm:$0xff] %v2261_v2  ;;  %v2083_v17 = vsel %vm1849_vm0, %v2074_v62, %v2082_v10 }
 0x378   :  { %v2104_v61 = vrot.slane %v2035_v23, 4  ;;  %v2171_v33 = vsel %vm4528_vm11, %v2083_v17, %v3798_v53 }
 0x379   :  { %v2203_v7 = vsel %vm4524_vm10, %v4331_v14, %v2171_v33 }
 0x37a   :  { %v2105_v1 = vsel %vm1849_vm0, %v2096_v9, %v2104_v61  ;;  %v2235_v42 = vadd.f32 %v2203_v7, %v3798_v53 }
 0x37b   :  { %v2214_v28 = vsel %vm4591_vm13, %v4403_v13, %v2105_v1  ;;  %v2017_v13 = vsel %vm2014_vm8, %v4478_v44, %v4476_v15  ;;  %v1997_v60 = vpop.permute.xlu1 %1996 }
 0x37c   :  { %v2246_v63 = vadd.f32 %v2214_v28, %v4134_v11  ;;  %v1993_v52 = vpop.permute.xlu0 %1992  ;;  %v2076_v11 = vrot.slane %v2024_v58, 4  ;;  %v2267_v4 = vmul.f32 0.25, %v2235_v42  ;;  %v2146_v2 = vrot.slane %v2017_v13, 4 }
 0x37d   :  { %v2027_v3 = vsel %vm2014_vm8, %v1991_v18, %v1993_v52  ;;  %v2028_v14 = vsel %vm2014_vm8, %v1993_v52, %v4518_v35  ;;  %v2052_v58 = vsel %vm2014_vm8, %v4482_v46, %v1997_v60 }
 0x37e   :  { %v2278_v48 = vmul.f32 0.25, %v2246_v63  ;;  %v4618_v21 = vpop.permute.xlu2 %2012  ;;  %v2084_v53 = vrot.slane %v2027_v3, 4  ;;  %v2086_v44 = vrot.slane %v2028_v14, 4  ;;  %2299 = vst [vmem:[%s4750_s5 + $0x40] sm:$0xff] %v2267_v4  ;;  %v2143_v4 = vrot.slane %v2047_v39, 4 }
 0x37f   :  { %v2038_v8 = vsel %vm2014_vm8, %v4618_v21, %v4474_v26 }
 0x380   :  { %2310 = vst [vmem:[%s4750_s5 + $0x98] sm:$0xff] %v2278_v48  ;;  %v2112_v18 = vrot.slane %v2038_v8, 4  ;;  %v2085_v35 = vsel %vm1849_vm0, %v2076_v11, %v2084_v53  ;;  %v2087_v9 = vsel %vm1849_vm0, %v2078_v40, %v2086_v44  ;;  %v2015_v44 = vsel %vm2014_vm8, %v4488_v59, %v4500_v49 }
 0x381   :  { %v2173_v32 = vsel %vm4550_vm12, %v2087_v9, %v4014_v38  ;;  %v2204_v61 = vsel %vm4524_vm10, %v4348_v29, %v2085_v35  ;;  %v2144_v49 = vrot.slane %v2015_v44, 4 }
 0x382   :  { %v2162_v62 = vsel %vm1849_vm0, %v2112_v18, %v2146_v2  ;;  %v2205_v10 = vsel %vm4524_vm10, %v4355_v6, %v2173_v32  ;;  %v2236_v1 = vadd.f32 %v2204_v61, %v5056_v0  ;;  %v2090_v6 = vrot.slane %v2052_v58, 4 }
 0x383   :  { %v2222_v17 = vsel %vm4629_vm14, %v4437_v31, %v2162_v62  ;;  %v2237_v28 = vadd.f32 %v2205_v10, %v4014_v38  ;;  %v2003_v51 = vpop.permute.xlu1 %2002 }
 0x384   :  { %v2254_v33 = vadd.f32 %v2222_v17, %v4294_v50  ;;  %v2268_v29 = vmul.f32 0.25, %v2236_v1  ;;  %v1999_v63 = vpop.permute.xlu0 %1998  ;;  %v2053_v0 = vsel %vm2014_vm8, %v4486_v27, %v2003_v51 }
 0x385   :  { %v2269_v7 = vmul.f32 0.25, %v2237_v28  ;;  %v2098_v38 = vrot.slane %v2053_v0, 4  ;;  %v2030_v46 = vsel %vm2014_vm8, %v1997_v60, %v1999_v63  ;;  %v2031_v27 = vsel %vm2014_vm8, %v1999_v63, %v4548_v22 }
 0x386   :  { %v2286_v36 = vmul.f32 0.25, %v2254_v33  ;;  %2300 = vst [vmem:[%s4750_s5 + $0x48] sm:$0xff] %v2268_v29  ;;  %v2092_v48 = vrot.slane %v2030_v46, 4  ;;  %v2094_v52 = vrot.slane %v2031_v27, 4 }
 0x387   :  { %2301 = vst [vmem:[%s4750_s5 + $0x50] sm:$0xff] %v2269_v7  ;;  %v2099_v50 = vsel %vm1849_vm0, %v2090_v6, %v2098_v38 }
 0x388   :  { %2318 = vst [vmem:[%s4750_s5 + $0xd8] sm:$0xff] %v2286_v36  ;;  %v2179_v31 = vsel %vm4528_vm11, %v2099_v50, %v4017_v20 }
 0x389   :  { %v2211_v57 = vsel %vm4591_vm13, %v4362_v5, %v2179_v31 }
 0x38a   :  { %v2243_v13 = vadd.f32 %v2211_v57, %v4017_v20 }
 0x38b   :  { %v2009_v11 = vpop.permute.xlu1 %2008 }
 0x38c   :  { %v2005_v42 = vpop.permute.xlu0 %2004  ;;  %v2275_v22 = vmul.f32 0.25, %v2243_v13  ;;  %v2054_v14 = vsel %vm2014_vm8, %v4474_v26, %v2009_v11 }
 0x38d   :  { %v2033_v3 = vsel %vm2014_vm8, %v2003_v51, %v2005_v42  ;;  %v2034_v60 = vsel %vm2014_vm8, %v2005_v42, %v4581_v45  ;;  %v2106_v40 = vrot.slane %v2054_v14, 4 }
 0x38e   :  { %v2100_v5 = vrot.slane %v2033_v3, 4  ;;  %v2102_v8 = vrot.slane %v2034_v60, 4  ;;  %2307 = vst [vmem:[%s4750_s5 + $0x80] sm:$0xff] %v2275_v22 }
 0x38f   :  { %v2159_v53 = vsel %vm1849_vm0, %v2106_v40, %v2143_v4 }
 0x390   :  { %v2101_v20 = vsel %vm1849_vm0, %v2092_v48, %v2100_v5  ;;  %v2103_v15 = vsel %vm1849_vm0, %v2094_v52, %v2102_v8  ;;  %v2187_v2 = vsel %vm4528_vm11, %v2159_v53, %v4144_v12 }
 0x391   :  { %v2181_v45 = vsel %vm4550_vm12, %v2103_v15, %v4138_v30  ;;  %v2212_v26 = vsel %vm4591_vm13, %v4376_v56, %v2101_v20  ;;  %v2219_v9 = vsel %vm4629_vm14, %v4369_v47, %v2187_v2 }
 0x392   :  { %v2213_v18 = vsel %vm4591_vm13, %v4414_v37, %v2181_v45  ;;  %v2244_v35 = vadd.f32 %v2212_v26, %v4164_v41  ;;  %v2251_v32 = vadd.f32 %v2219_v9, %v4144_v12  ;;  %v2145_v37 = vrot.slane %v4507_v55, 4 }
 0x393   :  { %v2245_v56 = vadd.f32 %v2213_v18, %v4138_v30 }
 0x394   :  { %v2276_v61 = vmul.f32 0.25, %v2244_v35  ;;  %v2011_v59 = vpop.permute.xlu0 %2010  ;;  %v2283_v41 = vmul.f32 0.25, %v2251_v32 }
 0x395   :  { %v2277_v62 = vmul.f32 0.25, %v2245_v56  ;;  %v2036_v25 = vsel %vm2014_vm8, %v2009_v11, %v2011_v59  ;;  %v2037_v19 = vsel %vm2014_vm8, %v2011_v59, %v4618_v21 }
 0x396   :  { %2308 = vst [vmem:[%s4750_s5 + $0x88] sm:$0xff] %v2276_v61  ;;  %v2108_v47 = vrot.slane %v2036_v25, 4  ;;  %v2110_v30 = vrot.slane %v2037_v19, 4 }
 0x397   :  { %2309 = vst [vmem:[%s4750_s5 + $0x90] sm:$0xff] %v2277_v62 }
 0x398   :  { %2315 = vst [vmem:[%s4750_s5 + $0xc0] sm:$0xff] %v2283_v41  ;;  %v2160_v12 = vsel %vm1849_vm0, %v2108_v47, %v2144_v49  ;;  %v2161_v21 = vsel %vm1849_vm0, %v2110_v30, %v2145_v37 }
 0x399   :  { %v2189_v55 = vsel %vm4550_vm12, %v2161_v21, %v4314_v16  ;;  %v2220_v10 = vsel %vm4629_vm14, %v4381_v24, %v2160_v12 }
 0x39a   :  { %v2221_v1 = vsel %vm4629_vm14, %v4442_v43, %v2189_v55  ;;  %v2252_v17 = vadd.f32 %v2220_v10, %v4217_v34 }
 0x39b   :  { %v2253_v28 = vadd.f32 %v2221_v1, %v4314_v16 }
 0x39c   :  { %v2284_v33 = vmul.f32 0.25, %v2252_v17 }
 0x39d   :  { %v2285_v58 = vmul.f32 0.25, %v2253_v28 }
 0x39e   :  { %2316 = vst [vmem:[%s4750_s5 + $0xc8] sm:$0xff] %v2284_v33 }
 0x39f   :  { %2317 = vst [vmem:[%s4750_s5 + $0xd0] sm:$0xff] %v2285_v58 }

</bundles_post_ra>
